<compile_context>
chip_gen: v6e
topology: v6e:2x2x1
jax: 0.10.0
libtpu: 0.0.40
codegen_flags: <defaults>
</compile_context>

<pallas_src>
import functools
import itertools

import numpy as np
import jax
import jax.numpy as jnp
from jax.experimental import pallas as pl
from jax.experimental.pallas import tpu as pltpu  # noqa: F401  (no grid / tiling needed at these sizes)


# ----------------------------------------------------------------------------
# Pallas kernel: single invocation, all scales fused, everything in VMEM.
# ----------------------------------------------------------------------------
def relation_kernel(used_scales, hidden,
                    x_ref, w1_ref, b1_ref, g_ref, sel_ref, w2_ref, bf_ref,
                    o_ref):
    # x_ref  : [B*n, F]        flattened input (row = b*n + item)
    # w1_ref : [F, SJ*H]       per-(scale, position-in-combination) slice of
    #                          Linear#1 weights, concatenated along lanes
    # b1_ref : [S, H]          Linear#1 bias per scale
    # g_ref  : [SJ, Mpad, B*n] one-hot gather matrices (zero rows = padding)
    # sel_ref: [S, B, Mpad]    mean-over-combinations matrix, pre-scaled by the
    #                          final linear's per-scale weight; zero cols mask
    #                          the padded combination rows
    # w2_ref : [S*H, O]        Linear#2 weights stacked over scales
    # bf_ref : [1, O]          sum_s lin_w[s]*b2_s + lin_b  (final bias, folded)
    # o_ref  : [B, O]
    H = hidden

    # ReLU commutes with the (one-hot) gather, so apply it to x once up front.
    xr = jnp.maximum(x_ref[...], 0.0)                               # [B*n, F]
    # Project every item through every (scale, position) weight slice at once.
    p = jnp.dot(xr, w1_ref[...], preferred_element_type=jnp.float32)  # [B*n, SJ*H]

    out = bf_ref[...]                                               # [1, O]
    sj = 0
    for s_idx, s in enumerate(used_scales):      # static, fully unrolled (S<=4)
        # h_pre[r*B+b] = b1 + sum_j ReLU(x)[b, combo_r[j]] @ W1_j
        hp = b1_ref[s_idx:s_idx + 1, :]                             # [1, H]
        for _ in range(s):
            hp = hp + jnp.dot(g_ref[sj], p[:, sj * H:(sj + 1) * H],
                              preferred_element_type=jnp.float32)   # [Mpad, H]
            sj += 1
        h = jnp.maximum(hp, 0.0)                                    # ReLU
        # Reassociated mean: z = (lin_w_s/R_s * sel) @ h  -> [B, H]
        z = jnp.dot(sel_ref[s_idx], h, preferred_element_type=jnp.float32)
        # Second Linear + accumulate the (folded) final linear over scales.
        out = out + jnp.dot(z, w2_ref[s_idx * H:(s_idx + 1) * H, :],
                            preferred_element_type=jnp.float32)     # [B, O]
    o_ref[...] = out


# ----------------------------------------------------------------------------
# Module wrapper (parameter setup + static packing cached per (batch, n))
# ----------------------------------------------------------------------------
class AbstractionRelationPallas:
    def __init__(self, in_features, out_features, bottleneck_dim=128, scales=4,
                 key=jax.random.PRNGKey(0)):
        self.in_features = in_features
        self.out_features = out_features
        self.bottleneck_dim = bottleneck_dim
        self.scales = (list(range(1, scales + 1))
                       if isinstance(scales, int) else list(scales))
        self.max_scale = max(self.scales)

        # Deterministic synthetic parameters (one Relation MLP per scale).
        self.params = {}
        for s in self.scales:
            key, k1, k2, k3, k4 = jax.random.split(key, 5)
            sf = s * in_features
            w1 = jax.random.normal(k1, (bottleneck_dim, sf), jnp.float32) * 0.1
            b1 = jax.random.normal(k2, (bottleneck_dim,), jnp.float32) * 0.1
            w2 = jax.random.normal(k3, (out_features, bottleneck_dim), jnp.float32) * 0.1
            b2 = jax.random.normal(k4, (out_features,), jnp.float32) * 0.1
            # store pre-transposed weights + 2D biases
            self.params[s] = (w1.T, b1[None, :], w2.T, b2[None, :])

        # nn.Linear(max_scale, 1) with constant init (weight=1, bias=0); kept
        # as real parameters — their values are folded into the packed sel /
        # bias constants at pack time.
        self.lin_w = jnp.ones((1, self.max_scale), jnp.float32)
        self.lin_b = jnp.zeros((1,), jnp.float32)

        self._pack_cache = {}

    # -- static packing (numpy, cached) ------------------------------------
    def _pack(self, batch, n):
        key = (batch, n)
        if key in self._pack_cache:
            return self._pack_cache[key]

        F = self.in_features
        H = self.bottleneck_dim
        O = self.out_features
        used = [int(s) for s in self.scales if s <= n]
        # TODO(synk): process_input path (n < min(scales): Python random.choice
        #             + recursion in the PyTorch module) is not implemented.
        assert used, "n smaller than all scales not supported"

        combos = [list(itertools.combinations(range(n), s)) for s in used]
        R = [len(c) for c in combos]
        S = len(used)
        SJ = sum(used)
        Bn = batch * n
        # Pad combination rows (r*B + b) up to a sublane multiple (140 -> 144).
        Mpad = max(8, -(-max(R) * batch // 8) * 8)

        w1_cat = np.zeros((F, SJ * H), np.float32)
        b1_all = np.zeros((S, H), np.float32)
        g_all = np.zeros((SJ, Mpad, Bn), np.float32)
        sel_all = np.zeros((S, batch, Mpad), np.float32)
        w2_cat = np.zeros((S * H, O), np.float32)
        b_fin = np.zeros((1, O), np.float32)

        lin_w = np.asarray(self.lin_w)
        lin_b = np.asarray(self.lin_b)

        sj = 0
        for s_idx, s in enumerate(used):
            w1t, b1, w2t, b2 = (np.asarray(a) for a in self.params[s])
            lw = float(lin_w[0, s - 1])
            for j in range(s):
                # Linear#1 weight slice for combination position j.
                w1_cat[:, sj * H:(sj + 1) * H] = w1t[j * F:(j + 1) * F, :]
                # One-hot gather: row m = r*B + b picks x row b*n + combo[r][j].
                for r, combo in enumerate(combos[s_idx]):
                    i = combo[j]
                    for b in range(batch):
                        g_all[sj, r * batch + b, b * n + i] = 1.0
                sj += 1
            b1_all[s_idx, :] = b1[0]
            # Mean over combinations, pre-scaled by the final linear's weight.
            # Padded rows (r >= R) get weight 0, which also masks their
            # (nonzero, bias-only) activations.
            for r in range(R[s_idx]):
                for b in range(batch):
                    sel_all[s_idx, b, r * batch + b] = lw / R[s_idx]
            w2_cat[s_idx * H:(s_idx + 1) * H, :] = w2t
            b_fin[0, :] += lw * b2[0]
        b_fin[0, :] += float(lin_b[0])

        packed = tuple(jnp.asarray(a) for a in
                       (w1_cat, b1_all, g_all, sel_all, w2_cat, b_fin))
        self._pack_cache[key] = (tuple(used), packed)
        return self._pack_cache[key]

    # -- forward -------------------------------------------------------------
    def __call__(self, x):
        # x: [B, n, F]
        B, n, F = x.shape
        used, packed = self._pack(B, n)

        x_flat = jnp.reshape(x, (B * n, F))

        # Grid-less call: whole arrays (~350 KiB total) are mapped into VMEM;
        # a single kernel invocation does the gather, both Linears, the mean
        # over combinations and the final linear over scales.
        out = pl.pallas_call(
            functools.partial(relation_kernel, used, self.bottleneck_dim),
            out_shape=jax.ShapeDtypeStruct((B, self.out_features), jnp.float32),
        )(x_flat, *packed)

        return out[:, None, :]                                      # [B, 1, O]

    # -- pure-JAX reference (independent path, no Pallas, no packing trick) --
    def reference(self, x):
        B, n, F = x.shape
        used = [int(s) for s in self.scales if s <= n]
        per_scale = []
        for s in used:
            w1t, b1, w2t, b2 = self.params[s]
            combos = jnp.asarray(
                list(itertools.combinations(range(n), s)), jnp.int32)
            R = combos.shape[0]
            xs = x[:, combos, :]                                    # [B, R, s, F]
            xs = jnp.transpose(xs, (1, 0, 2, 3)).reshape(R * B, s * F)
            h = jnp.maximum(jnp.maximum(xs, 0.0) @ w1t + b1, 0.0)
            y = (h @ w2t + b2).reshape(R, B, -1)
            per_scale.append(jnp.mean(y, axis=0))                   # [B, O]
        stacked = jnp.stack(per_scale, -1)                          # [B, O, S]
        w = self.lin_w[0, jnp.asarray([s - 1 for s in used])]
        return (jnp.tensordot(stacked, w, axes=([-1], [0]))
                + self.lin_b[0])[:, None, :]


if __name__ == "__main__":
    B, n, F = 2, 8, 32           # batch, num items (seq), in_features
    out_features = 32
    bottleneck = 128             # lane-dense hidden dimension
    num_scales = 4

    key = jax.random.PRNGKey(0)
    k_in, k_par = jax.random.split(key)
    x = jax.random.normal(k_in, (B, n, F), jnp.float32)

    module = AbstractionRelationPallas(
        in_features=F, out_features=out_features,
        bottleneck_dim=bottleneck, scales=num_scales, key=k_par)

    fwd = jax.jit(module.__call__)
    out = jax.block_until_ready(fwd(x))
    assert out.shape == (B, 1, out_features), out.shape

    ref = jax.block_until_ready(module.reference(x))
    err = float(jnp.max(jnp.abs(out - ref)))
    assert jnp.allclose(out, ref, atol=1e-3, rtol=1e-3), err

    print("KERNEL_OK")
</pallas_src>

<mosaic_0001>
module attributes {stable_mosaic.version = 11 : i64} {
  func.func @relation_kernel(%arg0: memref<16x32xf32, #tpu.memory_space<vmem>>, %arg1: memref<32x1280xf32, #tpu.memory_space<vmem>>, %arg2: memref<4x128xf32, #tpu.memory_space<vmem>>, %arg3: memref<10x144x16xf32, #tpu.memory_space<vmem>>, %arg4: memref<4x2x144xf32, #tpu.memory_space<vmem>>, %arg5: memref<512x32xf32, #tpu.memory_space<vmem>>, %arg6: memref<1x32xf32, #tpu.memory_space<vmem>>, %arg7: memref<2x32xf32, #tpu.memory_space<vmem>>) attributes {dimension_semantics = [], scalar_prefetch = 0 : i64, scratch_operands = 0 : i64, tpu.core_type = #tpu.core_type<tc>} {
    %c0 = arith.constant 0 : index
    %c0_0 = arith.constant 0 : index
    %0 = vector.load %arg0[%c0, %c0_0] : memref<16x32xf32, #tpu.memory_space<vmem>>, vector<16x32xf32>
    %cst = arith.constant 0.000000e+00 : f32
    %1 = vector.broadcast %cst : f32 to vector<16x32xf32>
    %2 = arith.maximumf %0, %1 : vector<16x32xf32>
    %c0_1 = arith.constant 0 : index
    %c0_2 = arith.constant 0 : index
    %3 = vector.load %arg1[%c0_1, %c0_2] : memref<32x1280xf32, #tpu.memory_space<vmem>>, vector<32x1280xf32>
    %cst_3 = arith.constant dense<0.000000e+00> : vector<16x1280xf32>
    %4 = tpu.matmul %2, %3, %cst_3 {dimension_numbers = #tpu.dot_dimension_numbers<[1], [0], [0], [1], [0, 0, 1, 1], [], []>} : vector<16x32xf32>, vector<32x1280xf32>, vector<16x1280xf32> -> vector<16x1280xf32>
    %c0_4 = arith.constant 0 : index
    %c0_5 = arith.constant 0 : index
    %5 = vector.load %arg6[%c0_4, %c0_5] : memref<1x32xf32, #tpu.memory_space<vmem>>, vector<1x32xf32>
    %c0_6 = arith.constant 0 : index
    %c0_7 = arith.constant 0 : index
    %6 = vector.load %arg2[%c0_6, %c0_7] : memref<4x128xf32, #tpu.memory_space<vmem>>, vector<1x128xf32>
    %c0_8 = arith.constant 0 : index
    %c0_9 = arith.constant 0 : index
    %c0_10 = arith.constant 0 : index
    %7 = vector.load %arg3[%c0_8, %c0_9, %c0_10] : memref<10x144x16xf32, #tpu.memory_space<vmem>>, vector<1x144x16xf32>
    %8 = vector.shape_cast %7 : vector<1x144x16xf32> to vector<144x16xf32>
    %9 = vector.extract_strided_slice %4 {offsets = [0, 0], sizes = [16, 128], strides = [1, 1]} : vector<16x1280xf32> to vector<16x128xf32>
    %cst_11 = arith.constant dense<0.000000e+00> : vector<144x128xf32>
    %10 = tpu.matmul %8, %9, %cst_11 {dimension_numbers = #tpu.dot_dimension_numbers<[1], [0], [0], [1], [0, 0, 1, 1], [], []>} : vector<144x16xf32>, vector<16x128xf32>, vector<144x128xf32> -> vector<144x128xf32>
    %11 = vector.broadcast %6 : vector<1x128xf32> to vector<144x128xf32>
    %12 = arith.addf %11, %10 : vector<144x128xf32>
    %cst_12 = arith.constant 0.000000e+00 : f32
    %13 = vector.broadcast %cst_12 : f32 to vector<144x128xf32>
    %14 = arith.maximumf %12, %13 : vector<144x128xf32>
    %c0_13 = arith.constant 0 : index
    %c0_14 = arith.constant 0 : index
    %c0_15 = arith.constant 0 : index
    %15 = vector.load %arg4[%c0_13, %c0_14, %c0_15] : memref<4x2x144xf32, #tpu.memory_space<vmem>>, vector<1x2x144xf32>
    %16 = vector.shape_cast %15 : vector<1x2x144xf32> to vector<2x144xf32>
    %cst_16 = arith.constant dense<0.000000e+00> : vector<2x128xf32>
    %17 = tpu.matmul %16, %14, %cst_16 {dimension_numbers = #tpu.dot_dimension_numbers<[1], [0], [0], [1], [0, 0, 1, 1], [], []>} : vector<2x144xf32>, vector<144x128xf32>, vector<2x128xf32> -> vector<2x128xf32>
    %c0_17 = arith.constant 0 : index
    %c0_18 = arith.constant 0 : index
    %18 = vector.load %arg5[%c0_17, %c0_18] : memref<512x32xf32, #tpu.memory_space<vmem>>, vector<128x32xf32>
    %cst_19 = arith.constant dense<0.000000e+00> : vector<2x32xf32>
    %19 = tpu.matmul %17, %18, %cst_19 {dimension_numbers = #tpu.dot_dimension_numbers<[1], [0], [0], [1], [0, 0, 1, 1], [], []>} : vector<2x128xf32>, vector<128x32xf32>, vector<2x32xf32> -> vector<2x32xf32>
    %20 = vector.broadcast %5 : vector<1x32xf32> to vector<2x32xf32>
    %21 = arith.addf %20, %19 : vector<2x32xf32>
    %c1 = arith.constant 1 : index
    %c0_20 = arith.constant 0 : index
    %22 = vector.load %arg2[%c1, %c0_20] : memref<4x128xf32, #tpu.memory_space<vmem>>, vector<1x128xf32>
    %c1_21 = arith.constant 1 : index
    %c0_22 = arith.constant 0 : index
    %c0_23 = arith.constant 0 : index
    %23 = vector.load %arg3[%c1_21, %c0_22, %c0_23] : memref<10x144x16xf32, #tpu.memory_space<vmem>>, vector<1x144x16xf32>
    %24 = vector.shape_cast %23 : vector<1x144x16xf32> to vector<144x16xf32>
    %25 = vector.extract_strided_slice %4 {offsets = [0, 128], sizes = [16, 128], strides = [1, 1]} : vector<16x1280xf32> to vector<16x128xf32>
    %cst_24 = arith.constant dense<0.000000e+00> : vector<144x128xf32>
    %26 = tpu.matmul %24, %25, %cst_24 {dimension_numbers = #tpu.dot_dimension_numbers<[1], [0], [0], [1], [0, 0, 1, 1], [], []>} : vector<144x16xf32>, vector<16x128xf32>, vector<144x128xf32> -> vector<144x128xf32>
    %27 = vector.broadcast %22 : vector<1x128xf32> to vector<144x128xf32>
    %28 = arith.addf %27, %26 : vector<144x128xf32>
    %c2 = arith.constant 2 : index
    %c0_25 = arith.constant 0 : index
    %c0_26 = arith.constant 0 : index
    %29 = vector.load %arg3[%c2, %c0_25, %c0_26] : memref<10x144x16xf32, #tpu.memory_space<vmem>>, vector<1x144x16xf32>
    %30 = vector.shape_cast %29 : vector<1x144x16xf32> to vector<144x16xf32>
    %31 = vector.extract_strided_slice %4 {offsets = [0, 256], sizes = [16, 128], strides = [1, 1]} : vector<16x1280xf32> to vector<16x128xf32>
    %cst_27 = arith.constant dense<0.000000e+00> : vector<144x128xf32>
    %32 = tpu.matmul %30, %31, %cst_27 {dimension_numbers = #tpu.dot_dimension_numbers<[1], [0], [0], [1], [0, 0, 1, 1], [], []>} : vector<144x16xf32>, vector<16x128xf32>, vector<144x128xf32> -> vector<144x128xf32>
    %33 = arith.addf %28, %32 : vector<144x128xf32>
    %cst_28 = arith.constant 0.000000e+00 : f32
    %34 = vector.broadcast %cst_28 : f32 to vector<144x128xf32>
    %35 = arith.maximumf %33, %34 : vector<144x128xf32>
    %c1_29 = arith.constant 1 : index
    %c0_30 = arith.constant 0 : index
    %c0_31 = arith.constant 0 : index
    %36 = vector.load %arg4[%c1_29, %c0_30, %c0_31] : memref<4x2x144xf32, #tpu.memory_space<vmem>>, vector<1x2x144xf32>
    %37 = vector.shape_cast %36 : vector<1x2x144xf32> to vector<2x144xf32>
    %cst_32 = arith.constant dense<0.000000e+00> : vector<2x128xf32>
    %38 = tpu.matmul %37, %35, %cst_32 {dimension_numbers = #tpu.dot_dimension_numbers<[1], [0], [0], [1], [0, 0, 1, 1], [], []>} : vector<2x144xf32>, vector<144x128xf32>, vector<2x128xf32> -> vector<2x128xf32>
    %c128 = arith.constant 128 : index
    %c0_33 = arith.constant 0 : index
    %39 = vector.load %arg5[%c128, %c0_33] : memref<512x32xf32, #tpu.memory_space<vmem>>, vector<128x32xf32>
    %cst_34 = arith.constant dense<0.000000e+00> : vector<2x32xf32>
    %40 = tpu.matmul %38, %39, %cst_34 {dimension_numbers = #tpu.dot_dimension_numbers<[1], [0], [0], [1], [0, 0, 1, 1], [], []>} : vector<2x128xf32>, vector<128x32xf32>, vector<2x32xf32> -> vector<2x32xf32>
    %41 = arith.addf %21, %40 : vector<2x32xf32>
    %c2_35 = arith.constant 2 : index
    %c0_36 = arith.constant 0 : index
    %42 = vector.load %arg2[%c2_35, %c0_36] : memref<4x128xf32, #tpu.memory_space<vmem>>, vector<1x128xf32>
    %c3 = arith.constant 3 : index
    %c0_37 = arith.constant 0 : index
    %c0_38 = arith.constant 0 : index
    %43 = vector.load %arg3[%c3, %c0_37, %c0_38] : memref<10x144x16xf32, #tpu.memory_space<vmem>>, vector<1x144x16xf32>
    %44 = vector.shape_cast %43 : vector<1x144x16xf32> to vector<144x16xf32>
    %45 = vector.extract_strided_slice %4 {offsets = [0, 384], sizes = [16, 128], strides = [1, 1]} : vector<16x1280xf32> to vector<16x128xf32>
    %cst_39 = arith.constant dense<0.000000e+00> : vector<144x128xf32>
    %46 = tpu.matmul %44, %45, %cst_39 {dimension_numbers = #tpu.dot_dimension_numbers<[1], [0], [0], [1], [0, 0, 1, 1], [], []>} : vector<144x16xf32>, vector<16x128xf32>, vector<144x128xf32> -> vector<144x128xf32>
    %47 = vector.broadcast %42 : vector<1x128xf32> to vector<144x128xf32>
    %48 = arith.addf %47, %46 : vector<144x128xf32>
    %c4 = arith.constant 4 : index
    %c0_40 = arith.constant 0 : index
    %c0_41 = arith.constant 0 : index
    %49 = vector.load %arg3[%c4, %c0_40, %c0_41] : memref<10x144x16xf32, #tpu.memory_space<vmem>>, vector<1x144x16xf32>
    %50 = vector.shape_cast %49 : vector<1x144x16xf32> to vector<144x16xf32>
    %51 = vector.extract_strided_slice %4 {offsets = [0, 512], sizes = [16, 128], strides = [1, 1]} : vector<16x1280xf32> to vector<16x128xf32>
    %cst_42 = arith.constant dense<0.000000e+00> : vector<144x128xf32>
    %52 = tpu.matmul %50, %51, %cst_42 {dimension_numbers = #tpu.dot_dimension_numbers<[1], [0], [0], [1], [0, 0, 1, 1], [], []>} : vector<144x16xf32>, vector<16x128xf32>, vector<144x128xf32> -> vector<144x128xf32>
    %53 = arith.addf %48, %52 : vector<144x128xf32>
    %c5 = arith.constant 5 : index
    %c0_43 = arith.constant 0 : index
    %c0_44 = arith.constant 0 : index
    %54 = vector.load %arg3[%c5, %c0_43, %c0_44] : memref<10x144x16xf32, #tpu.memory_space<vmem>>, vector<1x144x16xf32>
    %55 = vector.shape_cast %54 : vector<1x144x16xf32> to vector<144x16xf32>
    %56 = vector.extract_strided_slice %4 {offsets = [0, 640], sizes = [16, 128], strides = [1, 1]} : vector<16x1280xf32> to vector<16x128xf32>
    %cst_45 = arith.constant dense<0.000000e+00> : vector<144x128xf32>
    %57 = tpu.matmul %55, %56, %cst_45 {dimension_numbers = #tpu.dot_dimension_numbers<[1], [0], [0], [1], [0, 0, 1, 1], [], []>} : vector<144x16xf32>, vector<16x128xf32>, vector<144x128xf32> -> vector<144x128xf32>
    %58 = arith.addf %53, %57 : vector<144x128xf32>
    %cst_46 = arith.constant 0.000000e+00 : f32
    %59 = vector.broadcast %cst_46 : f32 to vector<144x128xf32>
    %60 = arith.maximumf %58, %59 : vector<144x128xf32>
    %c2_47 = arith.constant 2 : index
    %c0_48 = arith.constant 0 : index
    %c0_49 = arith.constant 0 : index
    %61 = vector.load %arg4[%c2_47, %c0_48, %c0_49] : memref<4x2x144xf32, #tpu.memory_space<vmem>>, vector<1x2x144xf32>
    %62 = vector.shape_cast %61 : vector<1x2x144xf32> to vector<2x144xf32>
    %cst_50 = arith.constant dense<0.000000e+00> : vector<2x128xf32>
    %63 = tpu.matmul %62, %60, %cst_50 {dimension_numbers = #tpu.dot_dimension_numbers<[1], [0], [0], [1], [0, 0, 1, 1], [], []>} : vector<2x144xf32>, vector<144x128xf32>, vector<2x128xf32> -> vector<2x128xf32>
    %c256 = arith.constant 256 : index
    %c0_51 = arith.constant 0 : index
    %64 = vector.load %arg5[%c256, %c0_51] : memref<512x32xf32, #tpu.memory_space<vmem>>, vector<128x32xf32>
    %cst_52 = arith.constant dense<0.000000e+00> : vector<2x32xf32>
    %65 = tpu.matmul %63, %64, %cst_52 {dimension_numbers = #tpu.dot_dimension_numbers<[1], [0], [0], [1], [0, 0, 1, 1], [], []>} : vector<2x128xf32>, vector<128x32xf32>, vector<2x32xf32> -> vector<2x32xf32>
    %66 = arith.addf %41, %65 : vector<2x32xf32>
    %c3_53 = arith.constant 3 : index
    %c0_54 = arith.constant 0 : index
    %67 = vector.load %arg2[%c3_53, %c0_54] : memref<4x128xf32, #tpu.memory_space<vmem>>, vector<1x128xf32>
    %c6 = arith.constant 6 : index
    %c0_55 = arith.constant 0 : index
    %c0_56 = arith.constant 0 : index
    %68 = vector.load %arg3[%c6, %c0_55, %c0_56] : memref<10x144x16xf32, #tpu.memory_space<vmem>>, vector<1x144x16xf32>
    %69 = vector.shape_cast %68 : vector<1x144x16xf32> to vector<144x16xf32>
    %70 = vector.extract_strided_slice %4 {offsets = [0, 768], sizes = [16, 128], strides = [1, 1]} : vector<16x1280xf32> to vector<16x128xf32>
    %cst_57 = arith.constant dense<0.000000e+00> : vector<144x128xf32>
    %71 = tpu.matmul %69, %70, %cst_57 {dimension_numbers = #tpu.dot_dimension_numbers<[1], [0], [0], [1], [0, 0, 1, 1], [], []>} : vector<144x16xf32>, vector<16x128xf32>, vector<144x128xf32> -> vector<144x128xf32>
    %72 = vector.broadcast %67 : vector<1x128xf32> to vector<144x128xf32>
    %73 = arith.addf %72, %71 : vector<144x128xf32>
    %c7 = arith.constant 7 : index
    %c0_58 = arith.constant 0 : index
    %c0_59 = arith.constant 0 : index
    %74 = vector.load %arg3[%c7, %c0_58, %c0_59] : memref<10x144x16xf32, #tpu.memory_space<vmem>>, vector<1x144x16xf32>
    %75 = vector.shape_cast %74 : vector<1x144x16xf32> to vector<144x16xf32>
    %76 = vector.extract_strided_slice %4 {offsets = [0, 896], sizes = [16, 128], strides = [1, 1]} : vector<16x1280xf32> to vector<16x128xf32>
    %cst_60 = arith.constant dense<0.000000e+00> : vector<144x128xf32>
    %77 = tpu.matmul %75, %76, %cst_60 {dimension_numbers = #tpu.dot_dimension_numbers<[1], [0], [0], [1], [0, 0, 1, 1], [], []>} : vector<144x16xf32>, vector<16x128xf32>, vector<144x128xf32> -> vector<144x128xf32>
    %78 = arith.addf %73, %77 : vector<144x128xf32>
    %c8 = arith.constant 8 : index
    %c0_61 = arith.constant 0 : index
    %c0_62 = arith.constant 0 : index
    %79 = vector.load %arg3[%c8, %c0_61, %c0_62] : memref<10x144x16xf32, #tpu.memory_space<vmem>>, vector<1x144x16xf32>
    %80 = vector.shape_cast %79 : vector<1x144x16xf32> to vector<144x16xf32>
    %81 = vector.extract_strided_slice %4 {offsets = [0, 1024], sizes = [16, 128], strides = [1, 1]} : vector<16x1280xf32> to vector<16x128xf32>
    %cst_63 = arith.constant dense<0.000000e+00> : vector<144x128xf32>
    %82 = tpu.matmul %80, %81, %cst_63 {dimension_numbers = #tpu.dot_dimension_numbers<[1], [0], [0], [1], [0, 0, 1, 1], [], []>} : vector<144x16xf32>, vector<16x128xf32>, vector<144x128xf32> -> vector<144x128xf32>
    %83 = arith.addf %78, %82 : vector<144x128xf32>
    %c9 = arith.constant 9 : index
    %c0_64 = arith.constant 0 : index
    %c0_65 = arith.constant 0 : index
    %84 = vector.load %arg3[%c9, %c0_64, %c0_65] : memref<10x144x16xf32, #tpu.memory_space<vmem>>, vector<1x144x16xf32>
    %85 = vector.shape_cast %84 : vector<1x144x16xf32> to vector<144x16xf32>
    %86 = vector.extract_strided_slice %4 {offsets = [0, 1152], sizes = [16, 128], strides = [1, 1]} : vector<16x1280xf32> to vector<16x128xf32>
    %cst_66 = arith.constant dense<0.000000e+00> : vector<144x128xf32>
    %87 = tpu.matmul %85, %86, %cst_66 {dimension_numbers = #tpu.dot_dimension_numbers<[1], [0], [0], [1], [0, 0, 1, 1], [], []>} : vector<144x16xf32>, vector<16x128xf32>, vector<144x128xf32> -> vector<144x128xf32>
    %88 = arith.addf %83, %87 : vector<144x128xf32>
    %cst_67 = arith.constant 0.000000e+00 : f32
    %89 = vector.broadcast %cst_67 : f32 to vector<144x128xf32>
    %90 = arith.maximumf %88, %89 : vector<144x128xf32>
    %c3_68 = arith.constant 3 : index
    %c0_69 = arith.constant 0 : index
    %c0_70 = arith.constant 0 : index
    %91 = vector.load %arg4[%c3_68, %c0_69, %c0_70] : memref<4x2x144xf32, #tpu.memory_space<vmem>>, vector<1x2x144xf32>
    %92 = vector.shape_cast %91 : vector<1x2x144xf32> to vector<2x144xf32>
    %cst_71 = arith.constant dense<0.000000e+00> : vector<2x128xf32>
    %93 = tpu.matmul %92, %90, %cst_71 {dimension_numbers = #tpu.dot_dimension_numbers<[1], [0], [0], [1], [0, 0, 1, 1], [], []>} : vector<2x144xf32>, vector<144x128xf32>, vector<2x128xf32> -> vector<2x128xf32>
    %c384 = arith.constant 384 : index
    %c0_72 = arith.constant 0 : index
    %94 = vector.load %arg5[%c384, %c0_72] : memref<512x32xf32, #tpu.memory_space<vmem>>, vector<128x32xf32>
    %cst_73 = arith.constant dense<0.000000e+00> : vector<2x32xf32>
    %95 = tpu.matmul %93, %94, %cst_73 {dimension_numbers = #tpu.dot_dimension_numbers<[1], [0], [0], [1], [0, 0, 1, 1], [], []>} : vector<2x128xf32>, vector<128x32xf32>, vector<2x32xf32> -> vector<2x32xf32>
    %96 = arith.addf %66, %95 : vector<2x32xf32>
    %c0_74 = arith.constant 0 : index
    %c0_75 = arith.constant 0 : index
    %97 = vector.load %arg7[%c0_74, %c0_75] : memref<2x32xf32, #tpu.memory_space<vmem>>, vector<2x32xf32>
    tpu.vector_store %arg7[%c0_74, %c0_75], %96 {strides = array<i32>} : memref<2x32xf32, #tpu.memory_space<vmem>>, vector<2x32xf32>,
    return
  }
}

</mosaic_0001>

<bundles_post_ra>
// kernel: a_call__.1
= control target key start
LH: loop header
LB: loop body
LE: loop exit
PB: predicated region body
PF: predicated region fallthrough
CT: control target
= control target key end

     0   :  { %12 = vsyncpa [#allocation3], 0  ;;  %s5751_s0 = inlined_call_operand.hbm [shape: f32[16,32], index: 0, kind: input, shape index: {}]   ;;  %s5752_s1 = inlined_call_operand.hbm [shape: f32[32,1280], index: 1, kind: input, shape index: {}]   ;;  %s5753_s2 = inlined_call_operand.vmem [shape: f32[4,128], index: 2, kind: input, shape index: {}]   ;;  %s5754_s3 = inlined_call_operand.hbm [shape: f32[10,144,16], index: 3, kind: input, shape index: {}]   ;;  %s5755_s4 = inlined_call_operand.hbm [shape: f32[4,2,144], index: 4, kind: input, shape index: {}]   ;;  %s5756_s5 = inlined_call_operand.hbm [shape: f32[512,32], index: 5, kind: input, shape index: {}]   ;;  %s5757_s6 = inlined_call_operand.vmem [shape: f32[1,32], index: 6, kind: input, shape index: {}]   ;;  %s5758_s7 = inlined_call_operand.hbm [shape: f32[2,32], index: 7, kind: output, shape index: {}]  }
   0x1   :  { %13 = vsyncpa [#allocation6], 0 }
   0x2   :  { %14 = vsyncpa [#allocation9], 0 }
   0x3   :  { %15 = vsyncpa [#allocation4], 0  ;;  %s4855_s24 = smov [#allocation5]  }
   0x4   :  { %s33_s25 = sshll.u32 %s4855_s24, 4  ;;  %s34_s25 = int_to_ptr.vmem [resolvable:$true] %s33_s25 }
   0x5   :  { %s4735_s26 = scalar_lea.vmem %s34_s25, 5120  ;;  %p4740_p1 = scmp.lt.s32.totalorder %s34_s25, %s34_s25 }
   0x6   :  { %p4736_p0 = scmp.ne.s32.totalorder %s34_s25, %s4735_s26  ;;  %p4741_p2 = scmp.lt.s32.totalorder %s4735_s26, %s4735_s26 }
   0x8   :  { %p4742_p3 = por %p4741_p2, %p4740_p1 }
   0xa   :  { %p4743_p4 = pnand %p4742_p3, %p4736_p0 }
   0xc   :  { %4746 = shalt.err (!%p4743_p4)
}
   0xd   :  { %s4856_s27 = smov 1280   ;;  %s4857_s28 = smov 80  }
   0xe   :  { %39 = dma.hbm_to_vmem [thread:$0]  %s5752_s1, 5120, %s34_s25, [#allocation6], %s4856_s27, %s4856_s27, %s4857_s28  }
   0xf   :  { %s4858_s8 = smov [#allocation8]  }
  0x10   :  { %s59_s9 = sshll.u32 %s4858_s8, 4  ;;  %s60_s9 = int_to_ptr.vmem [resolvable:$true] %s59_s9 }
  0x11   :  { %s4755_s10 = scalar_lea.vmem %s60_s9, 256  ;;  %p4760_p6 = scmp.lt.s32.totalorder %s60_s9, %s60_s9 }
  0x12   :  { %p4756_p5 = scmp.ne.s32.totalorder %s60_s9, %s4755_s10  ;;  %p4761_p7 = scmp.lt.s32.totalorder %s4755_s10, %s4755_s10 }
  0x14   :  { %p4762_p8 = por %p4761_p7, %p4760_p6 }
  0x16   :  { %p4763_p9 = pnand %p4762_p8, %p4756_p5 }
  0x18   :  { %4766 = shalt.err (!%p4763_p9)
}
  0x19   :  { %s4859_s11 = smov 64   ;;  %s4860_s12 = smov 4  }
  0x1a   :  { %65 = dma.hbm_to_vmem [thread:$0]  %s5755_s4, 256, %s60_s9, [#allocation9], %s4859_s11, %s4859_s11, %s4860_s12  }
  0x1b   :  { %s4861_s15 = smov [#allocation2]  }
  0x1c   :  { %s21_s16 = sshll.u32 %s4861_s15, 4  ;;  %s22_s16 = int_to_ptr.vmem [resolvable:$true] %s21_s16 }
  0x1d   :  { %s4775_s1 = scalar_lea.vmem %s22_s16, 256  ;;  %p4780_p11 = scmp.lt.s32.totalorder %s22_s16, %s22_s16 }
  0x1e   :  { %p4776_p10 = scmp.ne.s32.totalorder %s22_s16, %s4775_s1  ;;  %p4781_p12 = scmp.lt.s32.totalorder %s4775_s1, %s4775_s1 }
  0x20   :  { %p4782_p13 = por %p4781_p12, %p4780_p11 }
  0x22   :  { %p4783_p0 = pnand %p4782_p13, %p4776_p10 }
  0x24   :  { %4786 = shalt.err (!%p4783_p0)
}
  0x25   :  { %s4862_s17 = smov 128   ;;  %s4863_s18 = smov 8  }
  0x26   :  { %27 = dma.hbm_to_vmem [thread:$0]  %s5751_s0, 256, %s22_s16, [#allocation3], %s4862_s17, %s4862_s17, %s4863_s18  }
  0x27   :  { %s4864_s21 = smov [#allocation7]   ;;  %s4865_s4 = smov [#allocation10]  }
  0x28   :  { %s47_s22 = sshll.u32 %s4864_s21, 4  ;;  %s71_s23 = sshll.u32 %s4865_s4, 4  ;;  %s48_s22 = int_to_ptr.vmem [resolvable:$true] %s47_s22  ;;  %s72_s23 = int_to_ptr.vmem [resolvable:$true] %s71_s23 }
  0x29   :  { %s4795_s24 = scalar_lea.vmem %s48_s22, 23040  ;;  %p4800_p2 = scmp.lt.s32.totalorder %s48_s22, %s48_s22 }
  0x2a   :  { %p4796_p1 = scmp.ne.s32.totalorder %s48_s22, %s4795_s24  ;;  %p4801_p3 = scmp.lt.s32.totalorder %s4795_s24, %s4795_s24 }
  0x2c   :  { %p4802_p4 = por %p4801_p3, %p4800_p2 }
  0x2e   :  { %p4803_p5 = pnand %p4802_p4, %p4796_p1 }
  0x30   :  { %4806 = shalt.err (!%p4803_p5)
}
  0x31   :  { %53 = dma.hbm_to_vmem [thread:$0]  %s5754_s3, 23040, %s48_s22, [#allocation6], %s4862_s17, %s4862_s17, %s4863_s18  }
  0x32   :  { %s4815_s27 = scalar_lea.vmem %s72_s23, 8192  ;;  %p4820_p7 = scmp.lt.s32.totalorder %s72_s23, %s72_s23 }
  0x33   :  { %p4816_p6 = scmp.ne.s32.totalorder %s72_s23, %s4815_s27  ;;  %p4821_p8 = scmp.lt.s32.totalorder %s4815_s27, %s4815_s27 }
  0x35   :  { %p4822_p9 = por %p4821_p8, %p4820_p7 }
  0x37   :  { %p4823_p10 = pnand %p4822_p9, %p4816_p6 }
  0x39   :  { %4826 = shalt.err (!%p4823_p10)
}
  0x3a   :  { %77 = dma.hbm_to_vmem [thread:$0]  %s5756_s5, 8192, %s72_s23, [#allocation9], %s4862_s17, %s4862_s17, %s4863_s18  }
  0x3b   :  { %4847 = dma.done.wait [#allocation3], 256  }
  0x3c   :  { %4848 = vsyncadd [#allocation3], 4294967040 }
  0x3d   :  { %4849 = dma.done.wait [#allocation6], 28160  }
  0x3e   :  { %4850 = vsyncadd [#allocation6], 4294939136 }
  0x3f   :  { %4851 = dma.done.wait [#allocation9], 8448  }
  0x40   :  { %4852 = vsyncadd [#allocation9], 4294958848  ;;  %v5759_v0 = vmov 0.0   ;;  %v130_v1 = vld [vmem:[#allocation5 + $0xf8] sm:$0xff]  ;;  %v129_v2 = vld [vmem:[#allocation5 + $0xf0] sm:$0xff]  ;;  %vm139_vm0 = vcmask 261120  }
  0x41   :  { %210 = vmatprep.mubr.f32.mxu0 %v5759_v0  ;;  %287 = vmatprep.mubr.f32.mxu1 %v5759_v0  ;;  %v120_v3 = vld [vmem:[#allocation5 + $0xa8] sm:$0xff]  ;;  %v119_v4 = vld [vmem:[#allocation5 + $0xa0] sm:$0xff]  ;;  %v110_v5 = vld [vmem:[#allocation5 + $0x58] sm:$0xff]  ;;  %vm551_vm1 = vcmask 130048   ;;  %vm4867_vm2 = vmmov 0   ;;  %vm3773_vm3 = vcmask 254976  }
  0x42   :  { %170 = vmatprep.subr.mxu0 %v130_v1  ;;  %v95_v6 = vld [vmem:[#allocation2] sm:$0xff]  ;;  %v132_v8 = vld [vmem:[#allocation5 + $0x108] sm:$0xff]  ;;  %v131_v9 = vld [vmem:[#allocation5 + $0x100] sm:$0xff] }
  0x43   :  { %171 = vmatpush1.msra.mxu0 %v129_v2  ;;  %v109_v7 = vld [vmem:[#allocation5 + $0x50] sm:$0xff]  ;;  %v100_v10 = vld [vmem:[#allocation5 + $0x8] sm:$0xff]  ;;  %247 = vmatprep.subr.mxu1 %v132_v8  ;;  %v122_v11 = vld [vmem:[#allocation5 + $0xb8] sm:$0xff]  ;;  %v4926_v14 = vmax.f32 %v95_v6, 0.0 }
  0x44   :  { %172 = vmatprep.subr.mxu0 %v120_v3  ;;  %v121_v12 = vld [vmem:[#allocation5 + $0xb0] sm:$0xff]  ;;  %v99_v13 = vld [vmem:[#allocation5] sm:$0xff]  ;;  %248 = vmatpush1.msra.mxu1 %v131_v9  ;;  %v112_v15 = vld [vmem:[#allocation5 + $0x68] sm:$0xff] }
  0x45   :  { %173 = vmatpush1.msra.mxu0 %v119_v4  ;;  %v96_v16 = vld [vmem:[#allocation2 + $0x8] sm:$0xff]  ;;  %249 = vmatprep.subr.mxu1 %v122_v11  ;;  %v111_v17 = vld [vmem:[#allocation5 + $0x60] sm:$0xff]  ;;  %v101_v19 = vld [vmem:[#allocation5 + $0x10] sm:$0xff] }
  0x46   :  { %174 = vmatprep.subr.mxu0 %v110_v5  ;;  %250 = vmatpush1.msra.mxu1 %v121_v12  ;;  %v102_v18 = vld [vmem:[#allocation5 + $0x18] sm:$0xff]  ;;  %v4930_v20 = vmax.f32 %v96_v16, 0.0  ;;  %v136_v21 = vld [vmem:[#allocation5 + $0x128] sm:$0xff]  ;;  %v135_v22 = vld [vmem:[#allocation5 + $0x120] sm:$0xff] }
  0x47   :  { %175 = vmatpush1.msra.mxu0 %v109_v7  ;;  %251 = vmatprep.subr.mxu1 %v112_v15  ;;  %v126_v23 = vld [vmem:[#allocation5 + $0xd8] sm:$0xff]  ;;  %v125_v24 = vld [vmem:[#allocation5 + $0xd0] sm:$0xff]  ;;  %v116_v25 = vld [vmem:[#allocation5 + $0x88] sm:$0xff] }
  0x48   :  { %176 = vmatprep.subr.mxu0 %v100_v10  ;;  %252 = vmatpush1.msra.mxu1 %v111_v17  ;;  %v115_v26 = vld [vmem:[#allocation5 + $0x80] sm:$0xff]  ;;  %v106_v27 = vld [vmem:[#allocation5 + $0x38] sm:$0xff]  ;;  %v105_v28 = vld [vmem:[#allocation5 + $0x30] sm:$0xff] }
  0x49   :  { %177 = vmatpush1.msra.mxu0 %v99_v13  ;;  %253 = vmatprep.subr.mxu1 %v102_v18  ;;  %v533_v29 = vld [vmem:[#allocation7] sm:$0xff]  ;;  %v534_v33 = vld [vmem:[#allocation7 + $0x8] sm:$0xff]  ;;  %v535_v34 = vld [vmem:[#allocation7 + $0x10] sm:$0xff] }
  0x4a   :  { %3792 = vmatmul.mubr.msk.f32.vlgmr.msra.gmra.mxu0 %vm139_vm0, %v4926_v14  ;;  %254 = vmatpush1.msra.mxu1 %v101_v19  ;;  %v899_v35 = vld [vmem:[#allocation10 + $0x78] sm:$0xff]  ;;  %v898_v36 = vld [vmem:[#allocation10 + $0x70] sm:$0xff]  ;;  %v536_v37 = vld [vmem:[#allocation7 + $0x18] sm:$0xff] }
  0x4b   :  { %216 = vmatprep.mubr.f32.mxu0 %v5759_v0  ;;  %3794 = vmatmul.mubr.msk.f32.vlgmr.msra.gmra.mxu1 %vm139_vm0, %v4926_v14  ;;  %v537_v38 = vld [vmem:[#allocation7 + $0x20] sm:$0xff]  ;;  %v897_v39 = vld [vmem:[#allocation10 + $0x68] sm:$0xff]  ;;  %v896_v40 = vld [vmem:[#allocation10 + $0x60] sm:$0xff] }
  0x4c   :  { %401 = vmatprep.subr.mxu1 %v136_v21  ;;  %293 = vmatprep.mubr.f32.mxu1 %v5759_v0  ;;  %v538_v41 = vld [vmem:[#allocation7 + $0x28] sm:$0xff]  ;;  %v539_v42 = vld [vmem:[#allocation7 + $0x30] sm:$0xff]  ;;  %v894_v44 = vld [vmem:[#allocation10 + $0x50] sm:$0xff] }
  0x4d   :  { %402 = vmatpush1.msra.mxu1 %v135_v22  ;;  %v895_v43 = vld [vmem:[#allocation10 + $0x58] sm:$0xff]  ;;  %v540_v45 = vld [vmem:[#allocation7 + $0x38] sm:$0xff]  ;;  %v541_v46 = vld [vmem:[#allocation7 + $0x40] sm:$0xff] }
  0x4e   :  { %3793 = vmatmul.mubr.msk.f32.gmra.mxu0 %vm139_vm0, %v4930_v20  ;;  %403 = vmatprep.subr.mxu1 %v126_v23  ;;  %v893_v47 = vld [vmem:[#allocation10 + $0x48] sm:$0xff]  ;;  %v892_v48 = vld [vmem:[#allocation10 + $0x40] sm:$0xff]  ;;  %v542_v49 = vld [vmem:[#allocation7 + $0x48] sm:$0xff] }
  0x4f   :  { %404 = vmatpush1.msra.mxu1 %v125_v24  ;;  %364 = vmatprep.mubr.f32.mxu0 %v5759_v0  ;;  %v543_v50 = vld [vmem:[#allocation7 + $0x50] sm:$0xff]  ;;  %v891_v51 = vld [vmem:[#allocation10 + $0x38] sm:$0xff]  ;;  %v890_v52 = vld [vmem:[#allocation10 + $0x30] sm:$0xff] }
  0x50   :  { %3795 = vmatmul.mubr.msk.f32.gmra.mxu1 %vm139_vm0, %v4930_v20  ;;  %405 = vmatprep.subr.mxu1 %v116_v25  ;;  %v544_v53 = vld [vmem:[#allocation7 + $0x58] sm:$0xff]  ;;  %v545_v54 = vld [vmem:[#allocation7 + $0x60] sm:$0xff]  ;;  %v888_v56 = vld [vmem:[#allocation10 + $0x20] sm:$0xff] }
  0x51   :  { %406 = vmatpush1.msra.mxu1 %v115_v26  ;;  %441 = vmatprep.mubr.f32.mxu1 %v5759_v0  ;;  %v889_v55 = vld [vmem:[#allocation10 + $0x28] sm:$0xff]  ;;  %v546_v57 = vld [vmem:[#allocation7 + $0x68] sm:$0xff]  ;;  %v547_v58 = vld [vmem:[#allocation7 + $0x70] sm:$0xff] }
  0x52   :  { %407 = vmatprep.subr.mxu1 %v106_v27  ;;  %v887_v59 = vld [vmem:[#allocation10 + $0x18] sm:$0xff]  ;;  %v886_v61 = vld [vmem:[#allocation10 + $0x10] sm:$0xff]  ;;  %v548_v62 = vld [vmem:[#allocation7 + $0x78] sm:$0xff] }
  0x53   :  { %408 = vmatpush1.msra.mxu1 %v105_v28  ;;  %v549_v63 = vld [vmem:[#allocation7 + $0x80] sm:$0xff]  ;;  %v885_v1 = vld [vmem:[#allocation10 + $0x8] sm:$0xff]  ;;  %v884_v3 = vld [vmem:[#allocation10] sm:$0xff] }
  0x54   :  { %3798 = vmatmul.mubr.msk.f32.vlgmr.msra.gmra.mxu1 %vm139_vm0, %v4926_v14  ;;  %v550_v4 = vld [vmem:[#allocation7 + $0x88] sm:$0xff]  ;;  %v134_v6 = vld [vmem:[#allocation5 + $0x118] sm:$0xff]  ;;  %v133_v7 = vld [vmem:[#allocation5 + $0x110] sm:$0xff] }
  0x55   :  { %447 = vmatprep.mubr.f32.mxu1 %v5759_v0  ;;  %324 = vmatprep.subr.mxu0 %v134_v6  ;;  %v124_v8 = vld [vmem:[#allocation5 + $0xc8] sm:$0xff]  ;;  %v123_v9 = vld [vmem:[#allocation5 + $0xc0] sm:$0xff]  ;;  %v114_v10 = vld [vmem:[#allocation5 + $0x78] sm:$0xff] }
  0x56   :  { %325 = vmatpush1.msra.mxu0 %v133_v7  ;;  %v113_v11 = vld [vmem:[#allocation5 + $0x70] sm:$0xff]  ;;  %v104_v12 = vld [vmem:[#allocation5 + $0x28] sm:$0xff]  ;;  %v103_v13 = vld [vmem:[#allocation5 + $0x20] sm:$0xff] }
  0x57   :  { %326 = vmatprep.subr.mxu0 %v124_v8  ;;  %v138_v15 = vld [vmem:[#allocation5 + $0x138] sm:$0xff]  ;;  %v137_v16 = vld [vmem:[#allocation5 + $0x130] sm:$0xff]  ;;  %v128_v17 = vld [vmem:[#allocation5 + $0xe8] sm:$0xff] }
  0x58   :  { %3799 = vmatmul.mubr.msk.f32.gmra.mxu1 %vm139_vm0, %v4930_v20  ;;  %327 = vmatpush1.msra.mxu0 %v123_v9  ;;  %v127_v18 = vld [vmem:[#allocation5 + $0xe0] sm:$0xff]  ;;  %v118_v19 = vld [vmem:[#allocation5 + $0x98] sm:$0xff]  ;;  %v117_v21 = vld [vmem:[#allocation5 + $0x90] sm:$0xff] }
  0x59   :  { %4267 = vmatprep.mubr.msk.f32.mxu1 %vm551_vm1, %v533_v29  ;;  %328 = vmatprep.subr.mxu0 %v114_v10  ;;  %v108_v22 = vld [vmem:[#allocation5 + $0x48] sm:$0xff]  ;;  %v107_v23 = vld [vmem:[#allocation5 + $0x40] sm:$0xff] }
  0x5a   :  { %329 = vmatpush1.msra.mxu0 %v113_v11  ;;  %v5002_v24 = vld.sshfl [vmem:[#allocation8] sm:$0x33 pattern:$0x76325410] }
  0x5b   :  { %330 = vmatprep.subr.mxu0 %v104_v12  ;;  %v810_v25 = vcombine.high %v5002_v24, %v5002_v24 }
  0x5c   :  { %331 = vmatpush1.msra.mxu0 %v103_v13 }
  0x5d   :  { %478 = vmatprep.subr.mxu0 %v138_v15  ;;  %3796 = vmatmul.mubr.msk.f32.vlgmr.msra.gmra.mxu0 %vm139_vm0, %v4926_v14 }
  0x5e   :  { %479 = vmatpush1.msra.mxu0 %v137_v16  ;;  %370 = vmatprep.mubr.f32.mxu0 %v5759_v0 }
  0x5f   :  { %480 = vmatprep.subr.mxu0 %v128_v17 }
  0x60   :  { %481 = vmatpush1.msra.mxu0 %v127_v18 }
  0x61   :  { %482 = vmatprep.subr.mxu0 %v118_v19  ;;  %3797 = vmatmul.mubr.msk.f32.gmra.mxu0 %vm139_vm0, %v4930_v20 }
  0x62   :  { %483 = vmatpush1.msra.mxu0 %v117_v21  ;;  %518 = vmatprep.mubr.f32.mxu0 %v5759_v0 }
  0x63   :  { %484 = vmatprep.subr.mxu0 %v108_v22 }
  0x64   :  { %485 = vmatpush1.msra.mxu0 %v107_v23 }
  0x65   :  { %814 = vmatprep.subr.mxu0 %v5759_v0  ;;  %3800 = vmatmul.mubr.msk.f32.vlgmr.msra.gmra.mxu0 %vm139_vm0, %v4926_v14 }
  0x66   :  { %524 = vmatprep.mubr.f32.mxu0 %v5759_v0 }
  0x69   :  { %3801 = vmatmul.mubr.msk.f32.gmra.mxu0 %vm139_vm0, %v4930_v20 }
  0x6a   :  { %3822 = vmatprep.mubr.msk.f32.mxu0 %vm551_vm1, %v810_v25 }
 0x10a   :  { %v212_v30 = vpop.f32.mrf.mxu0 }
 0x10b   :  { %v4974_v60 = vpop.f32.mrf.mxu1 }
 0x10c   :  { %v4948_v31 = vpop.f32.mrf.mxu0 }
 0x10d   :  { %v4980_v2 = vpop.f32.mrf.mxu1 }
 0x10e   :  { %v218_v32 = vpop.f32.mrf.mxu0 }
 0x10f   :  { %4263 = vmatprep.subr.mxu1 %v218_v32 }
 0x110   :  { %4264 = vmatpush3.msra.mxu1 %v218_v32  ;;  %v4986_v5 = vpop.f32.mrf.mxu1 }
 0x111   :  { %4265 = vmatprep.subr.mxu1 %v212_v30 }
 0x112   :  { %4266 = vmatpush3.msra.mxu1 %v212_v30  ;;  %v5007_v26 = vpop.f32.mrf.mxu1 }
 0x113   :  { %4268 = vmatmul.mubr.msk.f32.vlgmr.msra.gmra.mxu1 %vm551_vm1, %v534_v33  ;;  %4294 = vmatprep.subr.mxu1 %v5759_v0 }
 0x114   :  { %4270 = vmatprep.mubr.msk.f32.mxu1 %vm551_vm1, %v535_v34  ;;  %4295 = vmatpush3.msra.mxu1 %v899_v35  ;;  %v5009_v27 = vpop.f32.mrf.mxu1 }
 0x115   :  { %4296 = vmatprep.subr.mxu1 %v5759_v0 }
 0x116   :  { %4297 = vmatpush3.msra.mxu1 %v898_v36  ;;  %v5011_v28 = vpop.f32.mrf.mxu1 }
 0x117   :  { %4271 = vmatmul.mubr.msk.f32.gmra.mxu1 %vm551_vm1, %v536_v37  ;;  %4298 = vmatprep.subr.mxu1 %v5759_v0  ;;  %5766 = vst [vmem:[#allocation16_spill] sm:$0xff] %v5011_v28 }
 0x118   :  { %4273 = vmatprep.mubr.msk.f32.mxu1 %vm551_vm1, %v537_v38  ;;  %4299 = vmatpush3.msra.mxu1 %v897_v39  ;;  %v5013_v29 = vpop.f32.mrf.mxu1 }
 0x119   :  { %4300 = vmatprep.subr.mxu1 %v5759_v0 }
 0x11a   :  { %4301 = vmatpush3.msra.mxu1 %v896_v40  ;;  %v5015_v14 = vpop.f32.mrf.mxu1 }
 0x11b   :  { %4274 = vmatmul.mubr.msk.f32.gmra.mxu1 %vm551_vm1, %v538_v41  ;;  %4302 = vmatprep.subr.mxu1 %v5759_v0  ;;  %5767 = vst [vmem:[#allocation17_spill] sm:$0xff] %v5015_v14 }
 0x11c   :  { %4276 = vmatprep.mubr.msk.f32.mxu1 %vm551_vm1, %v539_v42  ;;  %4303 = vmatpush3.msra.mxu1 %v895_v43 }
 0x11d   :  { %4304 = vmatprep.subr.mxu1 %v5759_v0 }
 0x11e   :  { %4305 = vmatpush3.msra.mxu1 %v894_v44  ;;  %v5024_v44 = vld [vmem:[%s5753_s2] ss:$0 sm:$0xff] }
 0x11f   :  { %4277 = vmatmul.mubr.msk.f32.gmra.mxu1 %vm551_vm1, %v540_v45  ;;  %4306 = vmatprep.subr.mxu1 %v5759_v0 }
 0x120   :  { %4279 = vmatprep.mubr.msk.f32.mxu1 %vm551_vm1, %v541_v46  ;;  %4307 = vmatpush3.msra.mxu1 %v893_v47 }
 0x121   :  { %4308 = vmatprep.subr.mxu1 %v5759_v0 }
 0x122   :  { %4309 = vmatpush3.msra.mxu1 %v892_v48 }
 0x123   :  { %4280 = vmatmul.mubr.msk.f32.gmra.mxu1 %vm551_vm1, %v542_v49  ;;  %4310 = vmatprep.subr.mxu1 %v5759_v0 }
 0x124   :  { %4282 = vmatprep.mubr.msk.f32.mxu1 %vm551_vm1, %v543_v50  ;;  %4311 = vmatpush3.msra.mxu1 %v891_v51 }
 0x125   :  { %4312 = vmatprep.subr.mxu1 %v5759_v0 }
 0x126   :  { %4313 = vmatpush3.msra.mxu1 %v890_v52 }
 0x127   :  { %4283 = vmatmul.mubr.msk.f32.gmra.mxu1 %vm551_vm1, %v544_v53  ;;  %4314 = vmatprep.subr.mxu1 %v5759_v0 }
 0x128   :  { %4285 = vmatprep.mubr.msk.f32.mxu1 %vm551_vm1, %v545_v54  ;;  %4315 = vmatpush3.msra.mxu1 %v889_v55 }
 0x129   :  { %4316 = vmatprep.subr.mxu1 %v5759_v0 }
 0x12a   :  { %4317 = vmatpush3.msra.mxu1 %v888_v56 }
 0x12b   :  { %4286 = vmatmul.mubr.msk.f32.gmra.mxu1 %vm551_vm1, %v546_v57  ;;  %4318 = vmatprep.subr.mxu1 %v5759_v0 }
 0x12c   :  { %4288 = vmatprep.mubr.msk.f32.mxu1 %vm551_vm1, %v547_v58  ;;  %4319 = vmatpush3.msra.mxu1 %v887_v59 }
 0x12d   :  { %4320 = vmatprep.subr.mxu1 %v5759_v0 }
 0x12e   :  { %4321 = vmatpush3.msra.mxu1 %v886_v61 }
 0x12f   :  { %4289 = vmatmul.mubr.msk.f32.gmra.mxu1 %vm551_vm1, %v548_v62  ;;  %4322 = vmatprep.subr.mxu1 %v5759_v0 }
 0x130   :  { %4291 = vmatprep.mubr.msk.f32.mxu1 %vm551_vm1, %v549_v63  ;;  %4323 = vmatpush3.msra.mxu1 %v885_v1 }
 0x131   :  { %4324 = vmatprep.subr.mxu1 %v5759_v0 }
 0x132   :  { %4325 = vmatpush3.msra.mxu1 %v884_v3 }
 0x133   :  { %4292 = vmatmul.mubr.msk.f32.gmra.mxu1 %vm551_vm1, %v550_v4  ;;  %4360 = vmatprep.subr.mxu1 %v4986_v5 }
 0x134   :  { %4326 = vmatprep.mubr.msk.f32.mxu1 %vm4867_vm2, %v5759_v0 }
 0x1d3   :  { %v5017_v30 = vpop.f32.mrf.mxu1 }
 0x1d4   :  { %v766_v15 = vadd.f32 %v5017_v30, %v5024_v44 }
 0x1d5   :  { %v5019_v20 = vpop.f32.mrf.mxu1 }
 0x1d6   :  { %v765_v17 = vadd.f32 %v5024_v44, %v5019_v20  ;;  %v784_v22 = vmax.f32 %v766_v15, 0.0  ;;  %v1238_v15 = vld [vmem:[#allocation7 + $0x168] sm:$0xff] }
 0x1d7   :  { %v4272_v32 = vpop.f32.mrf.mxu1 }
 0x1d8   :  { %v768_v9 = vadd.f32 %v4272_v32, %v5024_v44  ;;  %v783_v23 = vmax.f32 %v765_v17, 0.0  ;;  %v220_v32 = vpop.f32.mrf.mxu0  ;;  %v1239_v17 = vld [vmem:[#allocation7 + $0x170] sm:$0xff] }
 0x1d9   :  { %v682_v33 = vpop.f32.mrf.mxu1 }
 0x1da   :  { %v767_v11 = vadd.f32 %v5024_v44, %v682_v33  ;;  %v786_v16 = vmax.f32 %v768_v9, 0.0  ;;  %v979_v33 = vld [vmem:[#allocation7 + $0x90] sm:$0xff]  ;;  %v1586_v9 = vld [vmem:[#allocation10 + $0xd0] sm:$0xff] }
 0x1db   :  { %v4275_v34 = vpop.f32.mrf.mxu1 }
 0x1dc   :  { %v770_v4 = vadd.f32 %v4275_v34, %v5024_v44  ;;  %v785_v18 = vmax.f32 %v767_v11, 0.0  ;;  %v980_v34 = vld [vmem:[#allocation7 + $0x98] sm:$0xff] }
 0x1dd   :  { %v692_v35 = vpop.f32.mrf.mxu1  ;;  %v1585_v11 = vld [vmem:[#allocation10 + $0xc8] sm:$0xff] }
 0x1de   :  { %v769_v7 = vadd.f32 %v5024_v44, %v692_v35  ;;  %v788_v10 = vmax.f32 %v770_v4, 0.0  ;;  %v981_v35 = vld [vmem:[#allocation7 + $0xa0] sm:$0xff] }
 0x1df   :  { %v4278_v36 = vpop.f32.mrf.mxu1  ;;  %v1233_v4 = vld [vmem:[#allocation7 + $0x140] sm:$0xff] }
 0x1e0   :  { %v772_v62 = vadd.f32 %v4278_v36, %v5024_v44  ;;  %v787_v12 = vmax.f32 %v769_v7, 0.0  ;;  %v983_v36 = vld [vmem:[#allocation7 + $0xb0] sm:$0xff]  ;;  %v1587_v7 = vld [vmem:[#allocation10 + $0xd8] sm:$0xff] }
 0x1e1   :  { %v702_v37 = vpop.f32.mrf.mxu1 }
 0x1e2   :  { %v771_v1 = vadd.f32 %v5024_v44, %v702_v37  ;;  %v790_v6 = vmax.f32 %v772_v62, 0.0  ;;  %v985_v37 = vld [vmem:[#allocation7 + $0xc0] sm:$0xff]  ;;  %v1591_v62 = vld [vmem:[#allocation10 + $0xf8] sm:$0xff] }
 0x1e3   :  { %v4281_v38 = vpop.f32.mrf.mxu1 }
 0x1e4   :  { %v774_v57 = vadd.f32 %v4281_v38, %v5024_v44  ;;  %v789_v8 = vmax.f32 %v771_v1, 0.0  ;;  %v986_v38 = vld [vmem:[#allocation7 + $0xc8] sm:$0xff]  ;;  %v1590_v1 = vld [vmem:[#allocation10 + $0xf0] sm:$0xff] }
 0x1e5   :  { %v712_v39 = vpop.f32.mrf.mxu1 }
 0x1e6   :  { %v773_v59 = vadd.f32 %v5024_v44, %v712_v39  ;;  %v792_v63 = vmax.f32 %v774_v57, 0.0  ;;  %v987_v39 = vld [vmem:[#allocation7 + $0xd0] sm:$0xff]  ;;  %v1229_v57 = vld [vmem:[#allocation7 + $0x120] sm:$0xff] }
 0x1e7   :  { %v4284_v40 = vpop.f32.mrf.mxu1 }
 0x1e8   :  { %v776_v53 = vadd.f32 %v4284_v40, %v5024_v44  ;;  %v791_v3 = vmax.f32 %v773_v59, 0.0  ;;  %v988_v40 = vld [vmem:[#allocation7 + $0xd8] sm:$0xff] }
 0x1e9   :  { %v722_v41 = vpop.f32.mrf.mxu1 }
 0x1ea   :  { %v775_v55 = vadd.f32 %v5024_v44, %v722_v41  ;;  %v794_v58 = vmax.f32 %v776_v53, 0.0  ;;  %v989_v41 = vld [vmem:[#allocation7 + $0xe0] sm:$0xff] }
 0x1eb   :  { %v4287_v42 = vpop.f32.mrf.mxu1 }
 0x1ec   :  { %v778_v48 = vadd.f32 %v4287_v42, %v5024_v44  ;;  %v793_v61 = vmax.f32 %v775_v55, 0.0  ;;  %v990_v42 = vld [vmem:[#allocation7 + $0xe8] sm:$0xff] }
 0x1ed   :  { %v732_v43 = vpop.f32.mrf.mxu1 }
 0x1ee   :  { %v777_v51 = vadd.f32 %v5024_v44, %v732_v43  ;;  %v796_v54 = vmax.f32 %v778_v48, 0.0  ;;  %v991_v43 = vld [vmem:[#allocation7 + $0xf0] sm:$0xff]  ;;  %v996_v48 = vld [vmem:[#allocation7 + $0x118] sm:$0xff] }
 0x1ef   :  { %v4290_v45 = vpop.f32.mrf.mxu1 }
 0x1f0   :  { %v780_v46 = vadd.f32 %v4290_v45, %v5024_v44  ;;  %v795_v56 = vmax.f32 %v777_v51, 0.0  ;;  %v993_v45 = vld [vmem:[#allocation7 + $0x100] sm:$0xff] }
 0x1f1   :  { %v742_v47 = vpop.f32.mrf.mxu1 }
 0x1f2   :  { %v798_v49 = vmax.f32 %v780_v46, 0.0  ;;  %v779_v50 = vadd.f32 %v5024_v44, %v742_v47  ;;  %v994_v46 = vld [vmem:[#allocation7 + $0x108] sm:$0xff]  ;;  %v995_v47 = vld [vmem:[#allocation7 + $0x110] sm:$0xff] }
 0x1f3   :  { %v4293_v13 = vpop.f32.mrf.mxu1 }
 0x1f4   :  { %v797_v52 = vmax.f32 %v779_v50, 0.0  ;;  %815 = vmatpush1.msra.mxu0 %v798_v49  ;;  %v782_v19 = vadd.f32 %v4293_v13, %v5024_v44  ;;  %v5087_v49 = vpop.f32.mrf.mxu0  ;;  %v1584_v13 = vld [vmem:[#allocation10 + $0xc0] sm:$0xff] }
 0x1f5   :  { %816 = vmatprep.subr.mxu0 %v5759_v0  ;;  %v752_v21 = vpop.f32.mrf.mxu1 }
 0x1f6   :  { %817 = vmatpush1.msra.mxu0 %v797_v52  ;;  %v800_v25 = vmax.f32 %v782_v19, 0.0  ;;  %v781_v30 = vadd.f32 %v5024_v44, %v752_v21  ;;  %v992_v44 = vld [vmem:[#allocation7 + $0xf8] sm:$0xff]  ;;  %v5089_v50 = vpop.f32.mrf.mxu0 }
 0x1f7   :  { %818 = vmatprep.subr.mxu0 %v5759_v0  ;;  %v1240_v19 = vld [vmem:[#allocation7 + $0x178] sm:$0xff] }
 0x1f8   :  { %819 = vmatpush1.msra.mxu0 %v796_v54  ;;  %v799_v20 = vmax.f32 %v781_v30, 0.0  ;;  %v5091_v51 = vpop.f32.mrf.mxu0  ;;  %v1581_v21 = vld [vmem:[#allocation10 + $0xa8] sm:$0xff]  ;;  %v1579_v30 = vld [vmem:[#allocation10 + $0x98] sm:$0xff] }
 0x1f9   :  { %820 = vmatprep.subr.mxu0 %v5759_v0 }
 0x1fa   :  { %821 = vmatpush1.msra.mxu0 %v795_v56  ;;  %v5093_v52 = vpop.f32.mrf.mxu0 }
 0x1fb   :  { %822 = vmatprep.subr.mxu0 %v5759_v0 }
 0x1fc   :  { %823 = vmatpush1.msra.mxu0 %v794_v58  ;;  %v5095_v53 = vpop.f32.mrf.mxu0 }
 0x1fd   :  { %824 = vmatprep.subr.mxu0 %v5759_v0 }
 0x1fe   :  { %825 = vmatpush1.msra.mxu0 %v793_v61  ;;  %v5097_v54 = vpop.f32.mrf.mxu0  ;;  %v1230_v61 = vld [vmem:[#allocation7 + $0x128] sm:$0xff] }
 0x1ff   :  { %826 = vmatprep.subr.mxu0 %v5759_v0  ;;  %5768 = vst [vmem:[#allocation18_spill] sm:$0xff] %v5097_v54 }
 0x200   :  { %827 = vmatpush1.msra.mxu0 %v792_v63  ;;  %v5099_v55 = vpop.f32.mrf.mxu0  ;;  %v1231_v63 = vld [vmem:[#allocation7 + $0x130] sm:$0xff] }
 0x201   :  { %828 = vmatprep.subr.mxu0 %v5759_v0 }
 0x202   :  { %829 = vmatpush1.msra.mxu0 %v791_v3  ;;  %v5101_v56 = vpop.f32.mrf.mxu0  ;;  %v1232_v3 = vld [vmem:[#allocation7 + $0x138] sm:$0xff] }
 0x203   :  { %830 = vmatprep.subr.mxu0 %v5759_v0  ;;  %5769 = vst [vmem:[#allocation19_spill] sm:$0xff] %v5101_v56 }
 0x204   :  { %831 = vmatpush1.msra.mxu0 %v790_v6  ;;  %v1588_v6 = vld [vmem:[#allocation10 + $0xe0] sm:$0xff] }
 0x205   :  { %832 = vmatprep.subr.mxu0 %v5759_v0 }
 0x206   :  { %833 = vmatpush1.msra.mxu0 %v789_v8  ;;  %v1235_v8 = vld [vmem:[#allocation7 + $0x150] sm:$0xff] }
 0x207   :  { %834 = vmatprep.subr.mxu0 %v5759_v0 }
 0x208   :  { %835 = vmatpush1.msra.mxu0 %v788_v10  ;;  %v1236_v10 = vld [vmem:[#allocation7 + $0x158] sm:$0xff] }
 0x209   :  { %836 = vmatprep.subr.mxu0 %v5759_v0 }
 0x20a   :  { %837 = vmatpush1.msra.mxu0 %v787_v12  ;;  %v1237_v12 = vld [vmem:[#allocation7 + $0x160] sm:$0xff] }
 0x20b   :  { %838 = vmatprep.subr.mxu0 %v5759_v0 }
 0x20c   :  { %839 = vmatpush1.msra.mxu0 %v786_v16  ;;  %v1583_v16 = vld [vmem:[#allocation10 + $0xb8] sm:$0xff] }
 0x20d   :  { %840 = vmatprep.subr.mxu0 %v5759_v0 }
 0x20e   :  { %841 = vmatpush1.msra.mxu0 %v785_v18  ;;  %v1582_v18 = vld [vmem:[#allocation10 + $0xb0] sm:$0xff] }
 0x20f   :  { %842 = vmatprep.subr.mxu0 %v5759_v0 }
 0x210   :  { %843 = vmatpush1.msra.mxu0 %v784_v22  ;;  %v1241_v22 = vld [vmem:[#allocation7 + $0x180] sm:$0xff] }
 0x211   :  { %844 = vmatprep.subr.mxu0 %v5759_v0 }
 0x212   :  { %845 = vmatpush1.msra.mxu0 %v783_v23  ;;  %v1580_v23 = vld [vmem:[#allocation10 + $0xa0] sm:$0xff] }
 0x213   :  { %874 = vmatprep.subr.mxu0 %v5759_v0 }
 0x214   :  { %875 = vmatpush2.msra.mxu0 %v800_v25  ;;  %v1242_v25 = vld [vmem:[#allocation7 + $0x188] sm:$0xff] }
 0x215   :  { %876 = vmatprep.subr.mxu0 %v5759_v0 }
 0x216   :  { %877 = vmatpush2.msra.mxu0 %v799_v20  ;;  %v1243_v20 = vld [vmem:[#allocation7 + $0x190] sm:$0xff] }
 0x217   :  { %879 = vmatmul.mubr.f32.vlgmr.msra.gmra.mxu0 %v5002_v24  ;;  %4329 = vmatprep.subr.mxu0 %v220_v32  ;;  %v982_v24 = vld [vmem:[#allocation7 + $0xa8] sm:$0xff] }
 0x218   :  { %4330 = vmatpush3.msra.mxu0 %v220_v32  ;;  %4333 = vmatprep.mubr.msk.f32.mxu0 %vm551_vm1, %v979_v33  ;;  %v1578_v32 = vld [vmem:[#allocation10 + $0x90] sm:$0xff]  ;;  %v1244_v33 = vld [vmem:[#allocation7 + $0x198] sm:$0xff] }
 0x219   :  { %4331 = vmatprep.subr.mxu0 %v4948_v31 }
 0x21a   :  { %4332 = vmatpush3.msra.mxu0 %v4948_v31  ;;  %v984_v31 = vld [vmem:[#allocation7 + $0xb8] sm:$0xff] }
 0x21b   :  { %1506 = vmatprep.subr.mxu0 %v5759_v0  ;;  %4334 = vmatmul.mubr.msk.f32.vlgmr.msra.gmra.mxu0 %vm551_vm1, %v980_v34  ;;  %v1577_v34 = vld [vmem:[#allocation10 + $0x88] sm:$0xff] }
 0x21c   :  { %4336 = vmatprep.mubr.msk.f32.mxu0 %vm551_vm1, %v981_v35  ;;  %v1245_v35 = vld [vmem:[#allocation7 + $0x1a0] sm:$0xff] }
 0x21f   :  { %4337 = vmatmul.mubr.msk.f32.gmra.mxu0 %vm551_vm1, %v982_v24  ;;  %v1576_v24 = vld [vmem:[#allocation10 + $0x80] sm:$0xff] }
 0x220   :  { %4339 = vmatprep.mubr.msk.f32.mxu0 %vm551_vm1, %v983_v36  ;;  %v1246_v36 = vld [vmem:[#allocation7 + $0x1a8] sm:$0xff] }
 0x223   :  { %4340 = vmatmul.mubr.msk.f32.gmra.mxu0 %vm551_vm1, %v984_v31  ;;  %v5143_v31 = vld.sshfl [vmem:[#allocation8 + $0x4] sm:$0x33 pattern:$0x76325410] }
 0x224   :  { %4342 = vmatprep.mubr.msk.f32.mxu0 %vm551_vm1, %v985_v37  ;;  %v1502_v37 = vcombine.high %v5143_v31, %v5143_v31 }
 0x227   :  { %4343 = vmatmul.mubr.msk.f32.gmra.mxu0 %vm551_vm1, %v986_v38 }
 0x228   :  { %4345 = vmatprep.mubr.msk.f32.mxu0 %vm551_vm1, %v987_v39 }
 0x22b   :  { %4346 = vmatmul.mubr.msk.f32.gmra.mxu0 %vm551_vm1, %v988_v40 }
 0x22c   :  { %4348 = vmatprep.mubr.msk.f32.mxu0 %vm551_vm1, %v989_v41 }
 0x22f   :  { %4349 = vmatmul.mubr.msk.f32.gmra.mxu0 %vm551_vm1, %v990_v42 }
 0x230   :  { %4351 = vmatprep.mubr.msk.f32.mxu0 %vm551_vm1, %v991_v43 }
 0x233   :  { %4352 = vmatmul.mubr.msk.f32.gmra.mxu0 %vm551_vm1, %v992_v44 }
 0x234   :  { %4354 = vmatprep.mubr.msk.f32.mxu0 %vm551_vm1, %v993_v45 }
 0x237   :  { %4355 = vmatmul.mubr.msk.f32.gmra.mxu0 %vm551_vm1, %v994_v46 }
 0x238   :  { %4357 = vmatprep.mubr.msk.f32.mxu0 %vm551_vm1, %v995_v47 }
 0x23b   :  { %4358 = vmatmul.mubr.msk.f32.gmra.mxu0 %vm551_vm1, %v996_v48 }
 0x23c   :  { %3862 = vmatprep.mubr.msk.f32.mxu0 %vm551_vm1, %v1502_v37 }
 0x2d7   :  { %v880_v58 = vpop.f32.mrf.mxu0 }
 0x2d8   :  { %4327 = vmatmul.mubr.f32.vlgmr.msra.gmra.mxu1 %v880_v58 }
 0x2d9   :  { %4361 = vmatpush3.msra.mxu1 %v4986_v5  ;;  %v882_v59 = vpop.f32.mrf.mxu0  ;;  %4364 = vmatprep.mubr.msk.f32.mxu1 %vm551_vm1, %v1229_v57  ;;  %v1589_v5 = vld [vmem:[#allocation10 + $0xe8] sm:$0xff] }
 0x2da   :  { %4362 = vmatprep.subr.mxu1 %v4974_v60 }
 0x2db   :  { %4363 = vmatpush3.msra.mxu1 %v4974_v60  ;;  %v1234_v60 = vld [vmem:[#allocation7 + $0x148] sm:$0xff]  ;;  %v5148_v38 = vpop.f32.mrf.mxu0 }
 0x2dc   :  { %4391 = vmatprep.subr.mxu1 %v5759_v0  ;;  %4365 = vmatmul.mubr.msk.f32.vlgmr.msra.gmra.mxu1 %vm551_vm1, %v1230_v61 }
 0x2dd   :  { %4392 = vmatpush3.msra.mxu1 %v1591_v62  ;;  %4367 = vmatprep.mubr.msk.f32.mxu1 %vm551_vm1, %v1231_v63  ;;  %v5150_v39 = vpop.f32.mrf.mxu0 }
 0x2de   :  { %4393 = vmatprep.subr.mxu1 %v5759_v0 }
 0x2df   :  { %4394 = vmatpush3.msra.mxu1 %v1590_v1  ;;  %v5152_v40 = vpop.f32.mrf.mxu0 }
 0x2e0   :  { %4395 = vmatprep.subr.mxu1 %v5759_v0  ;;  %4368 = vmatmul.mubr.msk.f32.gmra.mxu1 %vm551_vm1, %v1232_v3 }
 0x2e1   :  { %4396 = vmatpush3.msra.mxu1 %v1589_v5  ;;  %4370 = vmatprep.mubr.msk.f32.mxu1 %vm551_vm1, %v1233_v4  ;;  %v5154_v41 = vpop.f32.mrf.mxu0 }
 0x2e2   :  { %4397 = vmatprep.subr.mxu1 %v5759_v0 }
 0x2e3   :  { %4398 = vmatpush3.msra.mxu1 %v1588_v6  ;;  %v5156_v42 = vpop.f32.mrf.mxu0 }
 0x2e4   :  { %4399 = vmatprep.subr.mxu1 %v5759_v0  ;;  %4371 = vmatmul.mubr.msk.f32.gmra.mxu1 %vm551_vm1, %v1234_v60 }
 0x2e5   :  { %4400 = vmatpush3.msra.mxu1 %v1587_v7  ;;  %4373 = vmatprep.mubr.msk.f32.mxu1 %vm551_vm1, %v1235_v8  ;;  %v5158_v43 = vpop.f32.mrf.mxu0 }
 0x2e6   :  { %4401 = vmatprep.subr.mxu1 %v5759_v0 }
 0x2e7   :  { %4402 = vmatpush3.msra.mxu1 %v1586_v9  ;;  %v4344_v44 = vpop.f32.mrf.mxu0 }
 0x2e8   :  { %4403 = vmatprep.subr.mxu1 %v5759_v0  ;;  %4374 = vmatmul.mubr.msk.f32.gmra.mxu1 %vm551_vm1, %v1236_v10 }
 0x2e9   :  { %4404 = vmatpush3.msra.mxu1 %v1585_v11  ;;  %4376 = vmatprep.mubr.msk.f32.mxu1 %vm551_vm1, %v1237_v12  ;;  %v1147_v45 = vpop.f32.mrf.mxu0 }
 0x2ea   :  { %4405 = vmatprep.subr.mxu1 %v5759_v0 }
 0x2eb   :  { %4406 = vmatpush3.msra.mxu1 %v1584_v13  ;;  %v4347_v48 = vpop.f32.mrf.mxu0  ;;  %v5177_v13 = vld [vmem:[%s5753_s2 + $0x1] ss:$0 sm:$0xff] }
 0x2ec   :  { %4407 = vmatprep.subr.mxu1 %v5759_v0  ;;  %4377 = vmatmul.mubr.msk.f32.gmra.mxu1 %vm551_vm1, %v1238_v15 }
 0x2ed   :  { %4408 = vmatpush3.msra.mxu1 %v1583_v16  ;;  %4379 = vmatprep.mubr.msk.f32.mxu1 %vm551_vm1, %v1239_v17  ;;  %v1157_v59 = vpop.f32.mrf.mxu0 }
 0x2ee   :  { %4409 = vmatprep.subr.mxu1 %v5759_v0 }
 0x2ef   :  { %4410 = vmatpush3.msra.mxu1 %v1582_v18  ;;  %v4350_v63 = vpop.f32.mrf.mxu0 }
 0x2f0   :  { %4411 = vmatprep.subr.mxu1 %v5759_v0  ;;  %4380 = vmatmul.mubr.msk.f32.gmra.mxu1 %vm551_vm1, %v1240_v19 }
 0x2f1   :  { %4412 = vmatpush3.msra.mxu1 %v1581_v21  ;;  %4382 = vmatprep.mubr.msk.f32.mxu1 %vm551_vm1, %v1241_v22  ;;  %v1167_v5 = vpop.f32.mrf.mxu0 }
 0x2f2   :  { %4413 = vmatprep.subr.mxu1 %v5759_v0  ;;  %v1220_v37 = vadd.f32 %v5177_v13, %v1167_v5 }
 0x2f3   :  { %4414 = vmatpush3.msra.mxu1 %v1580_v23  ;;  %v4353_v60 = vpop.f32.mrf.mxu0 }
 0x2f4   :  { %4415 = vmatprep.subr.mxu1 %v5759_v0  ;;  %4383 = vmatmul.mubr.msk.f32.gmra.mxu1 %vm551_vm1, %v1242_v25  ;;  %v1223_v19 = vadd.f32 %v4353_v60, %v5177_v13  ;;  %v1221_v25 = vadd.f32 %v4350_v63, %v5177_v13 }
 0x2f5   :  { %4416 = vmatpush3.msra.mxu1 %v1579_v30  ;;  %4385 = vmatprep.mubr.msk.f32.mxu1 %vm551_vm1, %v1243_v20  ;;  %v1177_v9 = vpop.f32.mrf.mxu0 }
 0x2f6   :  { %4417 = vmatprep.subr.mxu1 %v5759_v0  ;;  %v1222_v20 = vadd.f32 %v5177_v13, %v1177_v9  ;;  %v1217_v9 = vadd.f32 %v4344_v44, %v5177_v13 }
 0x2f7   :  { %4418 = vmatpush3.msra.mxu1 %v1578_v32  ;;  %v4356_v12 = vpop.f32.mrf.mxu0 }
 0x2f8   :  { %4419 = vmatprep.subr.mxu1 %v5759_v0  ;;  %4386 = vmatmul.mubr.msk.f32.gmra.mxu1 %vm551_vm1, %v1244_v33  ;;  %v1225_v16 = vadd.f32 %v4356_v12, %v5177_v13 }
 0x2f9   :  { %4420 = vmatpush3.msra.mxu1 %v1577_v34  ;;  %4388 = vmatprep.mubr.msk.f32.mxu1 %vm551_vm1, %v1245_v35  ;;  %v1187_v18 = vpop.f32.mrf.mxu0 }
 0x2fa   :  { %4421 = vmatprep.subr.mxu1 %v5759_v0  ;;  %v1224_v22 = vadd.f32 %v5177_v13, %v1187_v18 }
 0x2fb   :  { %4422 = vmatpush3.msra.mxu1 %v1576_v24 }
 0x2fc   :  { %4457 = vmatprep.subr.mxu1 %v5091_v51  ;;  %4389 = vmatmul.mubr.msk.f32.gmra.mxu1 %vm551_vm1, %v1246_v36  ;;  %v1219_v36 = vadd.f32 %v4347_v48, %v5177_v13 }
 0x2fd   :  { %4423 = vmatprep.mubr.msk.f32.mxu1 %vm4867_vm2, %v5759_v0 }
 0x398   :  { %v5160_v46 = vpop.f32.mrf.mxu1 }
 0x39a   :  { %v4328_v47 = vpop.f32.mrf.mxu1 }
 0x39c   :  { %v5162_v57 = vpop.f32.mrf.mxu1 }
 0x39e   :  { %v5164_v58 = vpop.f32.mrf.mxu1 }
 0x3a0   :  { %v5166_v61 = vpop.f32.mrf.mxu1 }
 0x3a2   :  { %v5168_v62 = vpop.f32.mrf.mxu1 }
 0x3a4   :  { %v5170_v1 = vpop.f32.mrf.mxu1 }
 0x3a6   :  { %v5172_v3 = vpop.f32.mrf.mxu1 }
 0x3a8   :  { %v4375_v4 = vpop.f32.mrf.mxu1 }
 0x3a9   :  { %v1463_v18 = vadd.f32 %v4375_v4, %v1217_v9  ;;  %v1676_v9 = vld [vmem:[#allocation7 + $0x208] sm:$0xff] }
 0x3aa   :  { %v1397_v6 = vpop.f32.mrf.mxu1 }
 0x3ac   :  { %v4378_v7 = vpop.f32.mrf.mxu1 }
 0x3ae   :  { %v1407_v8 = vpop.f32.mrf.mxu1 }
 0x3b0   :  { %v4381_v10 = vpop.f32.mrf.mxu1 }
 0x3b1   :  { %v1467_v47 = vadd.f32 %v4381_v10, %v1221_v25  ;;  %v1215_v10 = vadd.f32 %v5156_v42, %v5177_v13 }
 0x3b2   :  { %v1417_v11 = vpop.f32.mrf.mxu1 }
 0x3b3   :  { %v1466_v63 = vadd.f32 %v1417_v11, %v1220_v37  ;;  %v1216_v11 = vadd.f32 %v5177_v13, %v1147_v45  ;;  %v1461_v42 = vadd.f32 %v5170_v1, %v1215_v10  ;;  %v1666_v37 = vld [vmem:[#allocation7 + $0x1b8] sm:$0xff] }
 0x3b4   :  { %v4384_v15 = vpop.f32.mrf.mxu1  ;;  %v1682_v10 = vld [vmem:[#allocation7 + $0x238] sm:$0xff] }
 0x3b5   :  { %v1469_v32 = vadd.f32 %v4384_v15, %v1223_v19  ;;  %v1218_v15 = vadd.f32 %v5177_v13, %v1157_v59  ;;  %v1484_v5 = vmax.f32 %v1466_v63, 0.0  ;;  %v1462_v44 = vadd.f32 %v1397_v6, %v1216_v11  ;;  %v4359_v6 = vpop.f32.mrf.mxu0  ;;  %v1673_v63 = vld [vmem:[#allocation7 + $0x1f0] sm:$0xff] }
 0x3b6   :  { %v1427_v17 = vpop.f32.mrf.mxu1  ;;  %v1479_v1 = vmax.f32 %v1461_v42, 0.0  ;;  %v1227_v25 = vadd.f32 %v4359_v6, %v5177_v13  ;;  %v2161_v11 = vld [vmem:[#allocation7 + $0x2d0] sm:$0xff]  ;;  %v2174_v6 = vld [vmem:[#allocation7 + $0x338] sm:$0xff] }
 0x3b7   :  { %v1468_v35 = vadd.f32 %v1427_v17, %v1222_v20  ;;  %v1487_v60 = vmax.f32 %v1469_v32, 0.0  ;;  %v1485_v17 = vmax.f32 %v1467_v47, 0.0  ;;  %v1464_v48 = vadd.f32 %v1407_v8, %v1218_v15  ;;  %v1667_v47 = vld [vmem:[#allocation7 + $0x1c0] sm:$0xff]  ;;  %v1677_v15 = vld [vmem:[#allocation7 + $0x210] sm:$0xff] }
 0x3b8   :  { %v4387_v21 = vpop.f32.mrf.mxu1  ;;  %v1214_v8 = vadd.f32 %v5177_v13, %v5158_v43  ;;  %v1480_v4 = vmax.f32 %v1462_v44, 0.0  ;;  %v2164_v44 = vld [vmem:[#allocation7 + $0x2e8] sm:$0xff]  ;;  %v2169_v42 = vld [vmem:[#allocation7 + $0x310] sm:$0xff] }
 0x3b9   :  { %v1471_v23 = vadd.f32 %v4387_v21, %v1225_v16  ;;  %v1486_v12 = vmax.f32 %v1468_v35, 0.0  ;;  %v1465_v16 = vadd.f32 %v4378_v7, %v1219_v36  ;;  %v1482_v59 = vmax.f32 %v1464_v48, 0.0  ;;  %v1680_v48 = vld [vmem:[#allocation7 + $0x228] sm:$0xff] }
 0x3ba   :  { %v1437_v30 = vpop.f32.mrf.mxu1  ;;  %v1213_v7 = vadd.f32 %v5152_v40, %v5177_v13  ;;  %v1481_v21 = vmax.f32 %v1463_v18, 0.0  ;;  %v1460_v45 = vadd.f32 %v5172_v3, %v1214_v8  ;;  %v1212_v40 = vadd.f32 %v5177_v13, %v5154_v41  ;;  %v2162_v18 = vld [vmem:[#allocation7 + $0x2d8] sm:$0xff]  ;;  %v2167_v8 = vld [vmem:[#allocation7 + $0x300] sm:$0xff] }
 0x3bb   :  { %v1489_v33 = vmax.f32 %v1471_v23, 0.0  ;;  %v1470_v34 = vadd.f32 %v1437_v30, %v1224_v22  ;;  %v1483_v19 = vmax.f32 %v1465_v16, 0.0  ;;  %v1211_v22 = vadd.f32 %v5148_v38, %v5177_v13  ;;  %v1197_v30 = vpop.f32.mrf.mxu0  ;;  %v1678_v16 = vld [vmem:[#allocation7 + $0x218] sm:$0xff] }
 0x3bc   :  { %v1459_v43 = vadd.f32 %v5166_v61, %v1213_v7  ;;  %v1458_v23 = vadd.f32 %v5168_v62, %v1212_v40  ;;  %v1478_v3 = vmax.f32 %v1460_v45, 0.0  ;;  %v4390_v20 = vpop.f32.mrf.mxu1  ;;  %v1210_v38 = vadd.f32 %v5177_v13, %v5150_v39  ;;  %v2166_v7 = vld [vmem:[#allocation7 + $0x2f8] sm:$0xff]  ;;  %v2172_v45 = vld [vmem:[#allocation7 + $0x328] sm:$0xff] }
 0x3bd   :  { %v1488_v24 = vmax.f32 %v1470_v34, 0.0  ;;  %1507 = vmatpush1.msra.mxu0 %v1489_v33  ;;  %v1457_v41 = vadd.f32 %v5162_v57, %v1211_v22  ;;  %v1226_v33 = vadd.f32 %v5177_v13, %v1197_v30  ;;  %v1473_v34 = vadd.f32 %v4390_v20, %v1227_v25  ;;  %v1665_v13 = vld [vmem:[#allocation7 + $0x1b0] sm:$0xff]  ;;  %v2175_v22 = vld [vmem:[#allocation7 + $0x340] sm:$0xff]  ;;  %v2176_v40 = vld [vmem:[#allocation7 + $0x348] sm:$0xff] }
 0x3be   :  { %1508 = vmatprep.subr.mxu0 %v5759_v0  ;;  %v1477_v61 = vmax.f32 %v1459_v43, 0.0  ;;  %v1456_v32 = vadd.f32 %v5164_v58, %v1210_v38  ;;  %v1476_v62 = vmax.f32 %v1458_v23, 0.0  ;;  %v1447_v35 = vpop.f32.mrf.mxu1  ;;  %v2177_v43 = vld [vmem:[#allocation7 + $0x350] sm:$0xff]  ;;  %v2597_v23 = vld [vmem:[#allocation7 + $0x360] sm:$0xff]  ;;  %v1916_v38 = vld [vmem:[#allocation7 + $0x248] sm:$0xff] }
 0x3bf   :  { %1509 = vmatpush1.msra.mxu0 %v1488_v24  ;;  %v1475_v24 = vmax.f32 %v1457_v41, 0.0  ;;  %v1491_v57 = vmax.f32 %v1473_v34, 0.0  ;;  %v1472_v36 = vadd.f32 %v1447_v35, %v1226_v33  ;;  %v1915_v25 = vld [vmem:[#allocation7 + $0x240] sm:$0xff]  ;;  %v1917_v41 = vld [vmem:[#allocation7 + $0x250] sm:$0xff]  ;;  %v1926_v34 = vld [vmem:[#allocation7 + $0x298] sm:$0xff] }
 0x3c0   :  { %1510 = vmatprep.subr.mxu0 %v5759_v0  ;;  %v1474_v39 = vmax.f32 %v1456_v32, 0.0  ;;  %v1922_v32 = vld [vmem:[#allocation7 + $0x278] sm:$0xff]  ;;  %v1925_v33 = vld [vmem:[#allocation7 + $0x290] sm:$0xff]  ;;  %v1927_v35 = vld [vmem:[#allocation7 + $0x2a0] sm:$0xff] }
 0x3c1   :  { %1511 = vmatpush1.msra.mxu0 %v1487_v60  ;;  %v1490_v58 = vmax.f32 %v1472_v36, 0.0  ;;  %v1671_v60 = vld [vmem:[#allocation7 + $0x1e0] sm:$0xff] }
 0x3c2   :  { %1512 = vmatprep.subr.mxu0 %v5759_v0  ;;  %v1931_v36 = vld [vmem:[#allocation7 + $0x2c0] sm:$0xff] }
 0x3c3   :  { %1513 = vmatpush1.msra.mxu0 %v1486_v12  ;;  %v1674_v12 = vld [vmem:[#allocation7 + $0x1f8] sm:$0xff] }
 0x3c4   :  { %1514 = vmatprep.subr.mxu0 %v5759_v0 }
 0x3c5   :  { %1515 = vmatpush1.msra.mxu0 %v1485_v17  ;;  %v1679_v17 = vld [vmem:[#allocation7 + $0x220] sm:$0xff] }
 0x3c6   :  { %1516 = vmatprep.subr.mxu0 %v5759_v0 }
 0x3c7   :  { %1517 = vmatpush1.msra.mxu0 %v1484_v5  ;;  %v1681_v5 = vld [vmem:[#allocation7 + $0x230] sm:$0xff] }
 0x3c8   :  { %1518 = vmatprep.subr.mxu0 %v5759_v0 }
 0x3c9   :  { %1519 = vmatpush1.msra.mxu0 %v1483_v19  ;;  %v2163_v19 = vld [vmem:[#allocation7 + $0x2e0] sm:$0xff] }
 0x3ca   :  { %1520 = vmatprep.subr.mxu0 %v5759_v0 }
 0x3cb   :  { %1521 = vmatpush1.msra.mxu0 %v1482_v59  ;;  %v2165_v59 = vld [vmem:[#allocation7 + $0x2f0] sm:$0xff] }
 0x3cc   :  { %1522 = vmatprep.subr.mxu0 %v5759_v0 }
 0x3cd   :  { %1523 = vmatpush1.msra.mxu0 %v1481_v21  ;;  %v2170_v21 = vld [vmem:[#allocation7 + $0x318] sm:$0xff] }
 0x3ce   :  { %1524 = vmatprep.subr.mxu0 %v5759_v0 }
 0x3cf   :  { %1525 = vmatpush1.msra.mxu0 %v1480_v4  ;;  %v2173_v4 = vld [vmem:[#allocation7 + $0x330] sm:$0xff] }
 0x3d0   :  { %1526 = vmatprep.subr.mxu0 %v5759_v0 }
 0x3d1   :  { %1527 = vmatpush1.msra.mxu0 %v1479_v1  ;;  %v2178_v1 = vld [vmem:[#allocation7 + $0x358] sm:$0xff] }
 0x3d2   :  { %1528 = vmatprep.subr.mxu0 %v5759_v0 }
 0x3d3   :  { %1529 = vmatpush1.msra.mxu0 %v1478_v3  ;;  %v2598_v3 = vld [vmem:[#allocation7 + $0x368] sm:$0xff] }
 0x3d4   :  { %1530 = vmatprep.subr.mxu0 %v5759_v0 }
 0x3d5   :  { %1531 = vmatpush1.msra.mxu0 %v1477_v61  ;;  %v1921_v61 = vld [vmem:[#allocation7 + $0x270] sm:$0xff] }
 0x3d6   :  { %1532 = vmatprep.subr.mxu0 %v5759_v0 }
 0x3d7   :  { %1533 = vmatpush1.msra.mxu0 %v1476_v62  ;;  %v1924_v62 = vld [vmem:[#allocation7 + $0x288] sm:$0xff] }
 0x3d8   :  { %1534 = vmatprep.subr.mxu0 %v5759_v0 }
 0x3d9   :  { %1535 = vmatpush1.msra.mxu0 %v1475_v24  ;;  %v1928_v24 = vld [vmem:[#allocation7 + $0x2a8] sm:$0xff] }
 0x3da   :  { %1536 = vmatprep.subr.mxu0 %v5759_v0 }
 0x3db   :  { %1537 = vmatpush1.msra.mxu0 %v1474_v39  ;;  %v1929_v39 = vld [vmem:[#allocation7 + $0x2b0] sm:$0xff] }
 0x3dc   :  { %1566 = vmatprep.subr.mxu0 %v5759_v0 }
 0x3dd   :  { %1567 = vmatpush2.msra.mxu0 %v1491_v57  ;;  %v1930_v57 = vld [vmem:[#allocation7 + $0x2b8] sm:$0xff] }
 0x3de   :  { %1568 = vmatprep.subr.mxu0 %v5759_v0 }
 0x3df   :  { %1569 = vmatpush2.msra.mxu0 %v1490_v58  ;;  %v1932_v58 = vld [vmem:[#allocation7 + $0x2c8] sm:$0xff] }
 0x3e0   :  { %1571 = vmatmul.mubr.f32.vlgmr.msra.gmra.mxu0 %v5143_v31  ;;  %4426 = vmatprep.subr.mxu0 %v5007_v26  ;;  %v1668_v31 = vld [vmem:[#allocation7 + $0x1c8] sm:$0xff] }
 0x3e1   :  { %4427 = vmatpush3.msra.mxu0 %v5007_v26  ;;  %4430 = vmatprep.mubr.msk.f32.mxu0 %vm551_vm1, %v1665_v13  ;;  %v1669_v26 = vld [vmem:[#allocation7 + $0x1d0] sm:$0xff] }
 0x3e2   :  { %4428 = vmatprep.subr.mxu0 %v4980_v2 }
 0x3e3   :  { %4429 = vmatpush3.msra.mxu0 %v4980_v2  ;;  %v1670_v2 = vld [vmem:[#allocation7 + $0x1d8] sm:$0xff] }
 0x3e4   :  { %4431 = vmatmul.mubr.msk.f32.vlgmr.msra.gmra.mxu0 %vm551_vm1, %v1666_v37  ;;  %4488 = vmatprep.subr.mxu0 %v5093_v52 }
 0x3e5   :  { %4489 = vmatpush3.msra.mxu0 %v5093_v52  ;;  %4433 = vmatprep.mubr.msk.f32.mxu0 %vm551_vm1, %v1667_v47  ;;  %v1672_v52 = vld [vmem:[#allocation7 + $0x1e8] sm:$0xff] }
 0x3e6   :  { %4490 = vmatprep.subr.mxu0 %v5089_v50 }
 0x3e7   :  { %4491 = vmatpush3.msra.mxu0 %v5089_v50  ;;  %v1675_v50 = vld [vmem:[#allocation7 + $0x200] sm:$0xff] }
 0x3e8   :  { %4434 = vmatmul.mubr.msk.f32.gmra.mxu0 %vm551_vm1, %v1668_v31  ;;  %4554 = vmatprep.subr.mxu0 %v5013_v29 }
 0x3e9   :  { %4436 = vmatprep.mubr.msk.f32.mxu0 %vm551_vm1, %v1669_v26 }
 0x3ec   :  { %4437 = vmatmul.mubr.msk.f32.gmra.mxu0 %vm551_vm1, %v1670_v2 }
 0x3ed   :  { %4439 = vmatprep.mubr.msk.f32.mxu0 %vm551_vm1, %v1671_v60 }
 0x3f0   :  { %4440 = vmatmul.mubr.msk.f32.gmra.mxu0 %vm551_vm1, %v1672_v52 }
 0x3f1   :  { %4442 = vmatprep.mubr.msk.f32.mxu0 %vm551_vm1, %v1673_v63 }
 0x3f4   :  { %4443 = vmatmul.mubr.msk.f32.gmra.mxu0 %vm551_vm1, %v1674_v12 }
 0x3f5   :  { %4445 = vmatprep.mubr.msk.f32.mxu0 %vm551_vm1, %v1675_v50  ;;  %v5324_v50 = vld.sshfl [vmem:[#allocation8 + $0x8] sm:$0x33 pattern:$0x76325410] }
 0x3f8   :  { %4446 = vmatmul.mubr.msk.f32.gmra.mxu0 %vm551_vm1, %v1676_v9 }
 0x3f9   :  { %4448 = vmatprep.mubr.msk.f32.mxu0 %vm551_vm1, %v1677_v15  ;;  %v2434_v15 = vcombine.high %v5324_v50, %v5324_v50 }
 0x3fc   :  { %4449 = vmatmul.mubr.msk.f32.gmra.mxu0 %vm551_vm1, %v1678_v16 }
 0x3fd   :  { %4451 = vmatprep.mubr.msk.f32.mxu0 %vm551_vm1, %v1679_v17 }
 0x400   :  { %4452 = vmatmul.mubr.msk.f32.gmra.mxu0 %vm551_vm1, %v1680_v48 }
 0x401   :  { %4454 = vmatprep.mubr.msk.f32.mxu0 %vm551_vm1, %v1681_v5 }
 0x404   :  { %4455 = vmatmul.mubr.msk.f32.gmra.mxu0 %vm551_vm1, %v1682_v10 }
 0x405   :  { %4492 = vmatprep.mubr.msk.f32.mxu0 %vm551_vm1, %v2161_v11 }
 0x408   :  { %4493 = vmatmul.mubr.msk.f32.vlgmr.msra.gmra.mxu0 %vm551_vm1, %v2162_v18 }
 0x409   :  { %4555 = vmatpush3.msra.mxu0 %v5013_v29  ;;  %4495 = vmatprep.mubr.msk.f32.mxu0 %vm551_vm1, %v2163_v19  ;;  %v2168_v29 = vld [vmem:[#allocation7 + $0x308] sm:$0xff] }
 0x40a   :  { %4556 = vmatprep.subr.mxu0 %v5009_v27 }
 0x40b   :  { %4557 = vmatpush3.msra.mxu0 %v5009_v27  ;;  %v2171_v27 = vld [vmem:[#allocation7 + $0x320] sm:$0xff] }
 0x40c   :  { %4616 = vmatprep.subr.mxu0 %v5099_v55  ;;  %4496 = vmatmul.mubr.msk.f32.gmra.mxu0 %vm551_vm1, %v2164_v44  ;;  %v2599_v44 = vld [vmem:[#allocation7 + $0x370] sm:$0xff] }
 0x40d   :  { %4498 = vmatprep.mubr.msk.f32.mxu0 %vm551_vm1, %v2165_v59  ;;  %v2600_v59 = vld [vmem:[#allocation7 + $0x378] sm:$0xff] }
 0x410   :  { %4499 = vmatmul.mubr.msk.f32.gmra.mxu0 %vm551_vm1, %v2166_v7  ;;  %v2601_v7 = vld [vmem:[#allocation7 + $0x380] sm:$0xff] }
 0x411   :  { %4501 = vmatprep.mubr.msk.f32.mxu0 %vm551_vm1, %v2167_v8 }
 0x414   :  { %4502 = vmatmul.mubr.msk.f32.gmra.mxu0 %vm551_vm1, %v2168_v29  ;;  %v2602_v29 = vld [vmem:[#allocation7 + $0x388] sm:$0xff] }
 0x415   :  { %4504 = vmatprep.mubr.msk.f32.mxu0 %vm551_vm1, %v2169_v42  ;;  %v2603_v42 = vld [vmem:[#allocation7 + $0x390] sm:$0xff] }
 0x418   :  { %4505 = vmatmul.mubr.msk.f32.gmra.mxu0 %vm551_vm1, %v2170_v21 }
 0x419   :  { %4507 = vmatprep.mubr.msk.f32.mxu0 %vm551_vm1, %v2171_v27  ;;  %v2604_v27 = vld [vmem:[#allocation7 + $0x398] sm:$0xff] }
 0x41c   :  { %4508 = vmatmul.mubr.msk.f32.gmra.mxu0 %vm551_vm1, %v2172_v45  ;;  %v2605_v45 = vld [vmem:[#allocation7 + $0x3a0] sm:$0xff] }
 0x41d   :  { %4510 = vmatprep.mubr.msk.f32.mxu0 %vm551_vm1, %v2173_v4 }
 0x420   :  { %4511 = vmatmul.mubr.msk.f32.gmra.mxu0 %vm551_vm1, %v2174_v6  ;;  %v2606_v6 = vld [vmem:[#allocation7 + $0x3a8] sm:$0xff] }
 0x421   :  { %4513 = vmatprep.mubr.msk.f32.mxu0 %vm551_vm1, %v2175_v22  ;;  %v2607_v22 = vld [vmem:[#allocation7 + $0x3b0] sm:$0xff] }
 0x424   :  { %4514 = vmatmul.mubr.msk.f32.gmra.mxu0 %vm551_vm1, %v2176_v40 }
 0x425   :  { %4516 = vmatprep.mubr.msk.f32.mxu0 %vm551_vm1, %v2177_v43  ;;  %v2608_v43 = vld [vmem:[#allocation7 + $0x3b8] sm:$0xff] }
 0x428   :  { %4517 = vmatmul.mubr.msk.f32.gmra.mxu0 %vm551_vm1, %v2178_v1  ;;  %v2609_v1 = vld [vmem:[#allocation7 + $0x3c0] sm:$0xff] }
 0x429   :  { %4558 = vmatprep.mubr.msk.f32.mxu0 %vm551_vm1, %v2597_v23  ;;  %v3823_v23 = vld [vmem:[%s5757_s6] ss:$0 sm:$0xff] }
 0x42c   :  { %4559 = vmatmul.mubr.msk.f32.vlgmr.msra.gmra.mxu0 %vm551_vm1, %v2598_v3 }
 0x42d   :  { %4617 = vmatpush3.msra.mxu0 %v5099_v55  ;;  %v1919_v55 = vld [vmem:[#allocation7 + $0x260] sm:$0xff]  ;;  %4561 = vmatprep.mubr.msk.f32.mxu0 %vm551_vm1, %v2599_v44 }
 0x42e   :  { %4618 = vmatprep.subr.mxu0 %v5095_v53 }
 0x42f   :  { %4619 = vmatpush3.msra.mxu0 %v5095_v53  ;;  %v1918_v53 = vld [vmem:[#allocation7 + $0x258] sm:$0xff] }
 0x430   :  { %3616 = vmatprep.subr.mxu0 %v5759_v0  ;;  %4562 = vmatmul.mubr.msk.f32.gmra.mxu0 %vm551_vm1, %v2600_v59 }
 0x431   :  { %4564 = vmatprep.mubr.msk.f32.mxu0 %vm551_vm1, %v2601_v7 }
 0x434   :  { %4565 = vmatmul.mubr.msk.f32.gmra.mxu0 %vm551_vm1, %v2602_v29 }
 0x435   :  { %4567 = vmatprep.mubr.msk.f32.mxu0 %vm551_vm1, %v2603_v42  ;;  %v5394_v42 = vld [vmem:[%s5753_s2 + $0x2] ss:$0 sm:$0xff] }
 0x438   :  { %4568 = vmatmul.mubr.msk.f32.gmra.mxu0 %vm551_vm1, %v2604_v27 }
 0x439   :  { %4570 = vmatprep.mubr.msk.f32.mxu0 %vm551_vm1, %v2605_v45 }
 0x43c   :  { %4571 = vmatmul.mubr.msk.f32.gmra.mxu0 %vm551_vm1, %v2606_v6 }
 0x43d   :  { %4573 = vmatprep.mubr.msk.f32.mxu0 %vm551_vm1, %v2607_v22 }
 0x440   :  { %4574 = vmatmul.mubr.msk.f32.gmra.mxu0 %vm551_vm1, %v2608_v43 }
 0x441   :  { %4576 = vmatprep.mubr.msk.f32.mxu0 %vm551_vm1, %v2609_v1 }
 0x4a0   :  { %v1572_v30 = vpop.f32.mrf.mxu0 }
 0x4a1   :  { %4424 = vmatmul.mubr.f32.vlgmr.msra.gmra.mxu1 %v1572_v30  ;;  %v976_v30 = vadd.f32 %v3823_v23, %v5160_v46 }
 0x4a2   :  { %4458 = vmatpush3.msra.mxu1 %v5091_v51  ;;  %v1574_v20 = vpop.f32.mrf.mxu0  ;;  %4461 = vmatprep.mubr.msk.f32.mxu1 %vm551_vm1, %v1915_v25  ;;  %v1920_v51 = vld [vmem:[#allocation7 + $0x268] sm:$0xff] }
 0x4a3   :  { %4459 = vmatprep.subr.mxu1 %v5087_v49  ;;  %v2610_v25 = vld [vmem:[#allocation7 + $0x3c8] sm:$0xff] }
 0x4a4   :  { %4460 = vmatpush3.msra.mxu1 %v5087_v49  ;;  %v1923_v49 = vld [vmem:[#allocation7 + $0x280] sm:$0xff]  ;;  %v5304_v13 = vpop.f32.mrf.mxu0  ;;  %4577 = vmatmul.mubr.msk.f32.gmra.mxu0 %vm551_vm1, %v2610_v25 }
 0x4a5   :  { %4462 = vmatmul.mubr.msk.f32.vlgmr.msra.gmra.mxu1 %vm551_vm1, %v1916_v38  ;;  %2438 = vmatprep.subr.mxu1 %v5759_v0 }
 0x4a6   :  { %4464 = vmatprep.mubr.msk.f32.mxu1 %vm551_vm1, %v1917_v41  ;;  %v5306_v37 = vpop.f32.mrf.mxu0 }
 0x4a8   :  { %v5308_v47 = vpop.f32.mrf.mxu0 }
 0x4a9   :  { %4465 = vmatmul.mubr.msk.f32.gmra.mxu1 %vm551_vm1, %v1918_v53 }
 0x4aa   :  { %4467 = vmatprep.mubr.msk.f32.mxu1 %vm551_vm1, %v1919_v55  ;;  %v5310_v31 = vpop.f32.mrf.mxu0 }
 0x4ac   :  { %v5312_v26 = vpop.f32.mrf.mxu0 }
 0x4ad   :  { %4468 = vmatmul.mubr.msk.f32.gmra.mxu1 %vm551_vm1, %v1920_v51 }
 0x4ae   :  { %4470 = vmatprep.mubr.msk.f32.mxu1 %vm551_vm1, %v1921_v61  ;;  %v5314_v2 = vpop.f32.mrf.mxu0 }
 0x4b0   :  { %v5316_v60 = vpop.f32.mrf.mxu0 }
 0x4b1   :  { %4471 = vmatmul.mubr.msk.f32.gmra.mxu1 %vm551_vm1, %v1922_v32 }
 0x4b2   :  { %4473 = vmatprep.mubr.msk.f32.mxu1 %vm551_vm1, %v1923_v49  ;;  %v5318_v52 = vpop.f32.mrf.mxu0 }
 0x4b4   :  { %v5320_v63 = vpop.f32.mrf.mxu0 }
 0x4b5   :  { %4474 = vmatmul.mubr.msk.f32.gmra.mxu1 %vm551_vm1, %v1924_v62 }
 0x4b6   :  { %4476 = vmatprep.mubr.msk.f32.mxu1 %vm551_vm1, %v1925_v33  ;;  %v5322_v12 = vpop.f32.mrf.mxu0 }
 0x4b8   :  { %v5326_v9 = vpop.f32.mrf.mxu0 }
 0x4b9   :  { %4477 = vmatmul.mubr.msk.f32.gmra.mxu1 %vm551_vm1, %v1926_v34 }
 0x4ba   :  { %4479 = vmatprep.mubr.msk.f32.mxu1 %vm551_vm1, %v1927_v35  ;;  %v5331_v16 = vpop.f32.mrf.mxu0 }
 0x4bc   :  { %v5333_v17 = vpop.f32.mrf.mxu0 }
 0x4bd   :  { %4480 = vmatmul.mubr.msk.f32.gmra.mxu1 %vm551_vm1, %v1928_v24  ;;  %v1909_v45 = vadd.f32 %v5333_v17, %v5394_v42 }
 0x4be   :  { %4482 = vmatprep.mubr.msk.f32.mxu1 %vm551_vm1, %v1929_v39  ;;  %v5335_v48 = vpop.f32.mrf.mxu0 }
 0x4bf   :  { %v1908_v1 = vadd.f32 %v5394_v42, %v5335_v48 }
 0x4c0   :  { %v5337_v5 = vpop.f32.mrf.mxu0 }
 0x4c1   :  { %4483 = vmatmul.mubr.msk.f32.gmra.mxu1 %vm551_vm1, %v1930_v57  ;;  %v1911_v6 = vadd.f32 %v5337_v5, %v5394_v42  ;;  %v1906_v5 = vadd.f32 %v5394_v42, %v5331_v16 }
 0x4c2   :  { %4485 = vmatprep.mubr.msk.f32.mxu1 %vm551_vm1, %v1931_v36  ;;  %v5339_v10 = vpop.f32.mrf.mxu0 }
 0x4c3   :  { %v1910_v23 = vadd.f32 %v5394_v42, %v5339_v10  ;;  %v1905_v10 = vadd.f32 %v5320_v63, %v5394_v42 }
 0x4c4   :  { %v5341_v11 = vpop.f32.mrf.mxu0 }
 0x4c5   :  { %4486 = vmatmul.mubr.msk.f32.gmra.mxu1 %vm551_vm1, %v1932_v58 }
 0x4c6   :  { %3919 = vmatprep.mubr.msk.f32.mxu1 %vm551_vm1, %v2434_v15  ;;  %v5343_v18 = vpop.f32.mrf.mxu0 }
 0x4c8   :  { %v5345_v19 = vpop.f32.mrf.mxu0 }
 0x4ca   :  { %v5348_v8 = vpop.f32.mrf.mxu0 }
 0x4cc   :  { %v5352_v21 = vpop.f32.mrf.mxu0 }
 0x4ce   :  { %v5356_v4 = vpop.f32.mrf.mxu0 }
 0x4d0   :  { %v5360_v40 = vpop.f32.mrf.mxu0 }
 0x4d2   :  { %v5367_v3 = vpop.f32.mrf.mxu0 }
 0x4d4   :  { %v5372_v38 = vpop.f32.mrf.mxu0 }
 0x4d6   :  { %v5379_v51 = vpop.f32.mrf.mxu0 }
 0x4d8   :  { %v4506_v49 = vpop.f32.mrf.mxu0 }
 0x4da   :  { %v2339_v33 = vpop.f32.mrf.mxu0 }
 0x4dc   :  { %v4509_v24 = vpop.f32.mrf.mxu0 }
 0x4de   :  { %v2349_v36 = vpop.f32.mrf.mxu0 }
 0x4e0   :  { %v4512_v44 = vpop.f32.mrf.mxu0 }
 0x4e2   :  { %v2359_v29 = vpop.f32.mrf.mxu0 }
 0x4e4   :  { %v4515_v43 = vpop.f32.mrf.mxu0 }
 0x4e6   :  { %v2369_v54 = vpop.f32.mrf.mxu0 }
 0x561   :  { %v1658_v20 = vpop.f32.mrf.mxu1 }
 0x562   :  { %v5375_v41 = vadd.f32 %v1658_v20, %v976_v30 }
 0x563   :  { %v4425_v53 = vpop.f32.mrf.mxu1 }
 0x564   :  { %5770 = vst [vmem:[#allocation20_spill] sm:$0xff] %v5375_v41  ;;  %v1907_v53 = vadd.f32 %v5326_v9, %v5394_v42  ;;  %v1904_v9 = vadd.f32 %v5394_v42, %v5322_v12 }
 0x565   :  { %v5377_v55 = vpop.f32.mrf.mxu1 }
 0x567   :  { %v5381_v61 = vpop.f32.mrf.mxu1 }
 0x569   :  { %v5383_v32 = vpop.f32.mrf.mxu1 }
 0x56b   :  { %v5385_v62 = vpop.f32.mrf.mxu1 }
 0x56d   :  { %v5387_v46 = vpop.f32.mrf.mxu1 }
 0x56f   :  { %v5389_v34 = vpop.f32.mrf.mxu1 }
 0x571   :  { %v4472_v35 = vpop.f32.mrf.mxu1 }
 0x573   :  { %v2083_v39 = vpop.f32.mrf.mxu1 }
 0x575   :  { %v4475_v57 = vpop.f32.mrf.mxu1 }
 0x577   :  { %v2093_v58 = vpop.f32.mrf.mxu1 }
 0x579   :  { %v4478_v15 = vpop.f32.mrf.mxu1 }
 0x57a   :  { %v2153_v56 = vadd.f32 %v4478_v15, %v1907_v53 }
 0x57b   :  { %v2103_v59 = vpop.f32.mrf.mxu1 }
 0x57d   :  { %v4481_v7 = vpop.f32.mrf.mxu1 }
 0x57e   :  { %v2155_v25 = vadd.f32 %v4481_v7, %v1909_v45  ;;  %v2152_v7 = vadd.f32 %v2103_v59, %v1906_v5 }
 0x57f   :  { %v2113_v27 = vpop.f32.mrf.mxu1 }
 0x580   :  { %v2154_v0 = vadd.f32 %v2113_v27, %v1908_v1  ;;  %v2401_v28 = vadd.f32 %v4512_v44, %v2155_v25  ;;  %v2151_v27 = vadd.f32 %v4475_v57, %v1905_v10  ;;  %v2398_v63 = vadd.f32 %v2349_v36, %v2152_v7  ;;  %v2522_v10 = vld [vmem:[#allocation10 + $0x170] sm:$0xff]  ;;  %v2521_v7 = vld [vmem:[#allocation10 + $0x168] sm:$0xff] }
 0x581   :  { %v4484_v22 = vpop.f32.mrf.mxu1  ;;  %v1900_v36 = vadd.f32 %v5394_v42, %v5314_v2  ;;  %v1898_v2 = vadd.f32 %v5394_v42, %v5310_v31  ;;  %v1896_v31 = vadd.f32 %v5394_v42, %v5306_v37  ;;  %v1912_v37 = vadd.f32 %v5394_v42, %v5343_v18 }
 0x582   :  { %v2157_v30 = vadd.f32 %v4484_v22, %v1911_v6  ;;  %v2400_v45 = vadd.f32 %v2359_v29, %v2154_v0  ;;  %v5771_v22 = vmov 0.0   ;;  %v2419_v16 = vmax.f32 %v2401_v28, 0.0 }
 0x583   :  { %v2123_v20 = vpop.f32.mrf.mxu1  ;;  %v1902_v0 = vadd.f32 %v5394_v42, %v5318_v52  ;;  %v2397_v12 = vadd.f32 %v4506_v49, %v2151_v27  ;;  %v1901_v28 = vadd.f32 %v5312_v26, %v5394_v42  ;;  %v1899_v26 = vadd.f32 %v5308_v47, %v5394_v42  ;;  %v2516_v27 = vld [vmem:[#allocation10 + $0x140] sm:$0xff] }
 0x584   :  { %v2156_v41 = vadd.f32 %v2123_v20, %v1910_v23  ;;  %v2403_v17 = vadd.f32 %v4515_v43, %v2157_v30  ;;  %v2399_v43 = vadd.f32 %v4509_v24, %v2153_v56  ;;  %v2418_v15 = vmax.f32 %v2400_v45, 0.0  ;;  %v4518_v30 = vpop.f32.mrf.mxu0  ;;  %v2520_v45 = vld [vmem:[#allocation10 + $0x160] sm:$0xff] }
 0x585   :  { %v2148_v56 = vadd.f32 %v2083_v39, %v1902_v0  ;;  %v2416_v24 = vmax.f32 %v2398_v63, 0.0  ;;  %v2147_v52 = vadd.f32 %v5387_v46, %v1901_v28  ;;  %v1897_v47 = vadd.f32 %v5304_v13, %v5394_v42  ;;  %v4487_v29 = vpop.f32.mrf.mxu1  ;;  %v2511_v63 = vld [vmem:[#allocation10 + $0x118] sm:$0xff]  ;;  %v2509_v0 = vld [vmem:[#allocation10 + $0x108] sm:$0xff] }
 0x586   :  { %v2421_v14 = vmax.f32 %v2403_v17, 0.0  ;;  %v2402_v48 = vadd.f32 %v2369_v54, %v2156_v41  ;;  %v1903_v54 = vadd.f32 %v5316_v60, %v5394_v42  ;;  %v2150_v41 = vadd.f32 %v2093_v58, %v1904_v9  ;;  %v2379_v53 = vpop.f32.mrf.mxu0  ;;  %v2517_v9 = vld [vmem:[#allocation10 + $0x148] sm:$0xff] }
 0x587   :  { %v2417_v57 = vmax.f32 %v2399_v43, 0.0  ;;  %v2394_v39 = vadd.f32 %v5379_v51, %v2148_v56  ;;  %v2393_v46 = vadd.f32 %v5360_v40, %v2147_v52  ;;  %v2144_v51 = vadd.f32 %v5385_v62, %v1898_v2  ;;  %v2133_v25 = vpop.f32.mrf.mxu1  ;;  %v2515_v43 = vld [vmem:[#allocation10 + $0x138] sm:$0xff]  ;;  %v2612_v28 = vld [vmem:[#allocation7 + $0x3d8] sm:$0xff]  ;;  %v2613_v56 = vld [vmem:[#allocation7 + $0x3e0] sm:$0xff] }
 0x588   :  { %v2420_v6 = vmax.f32 %v2402_v48, 0.0  ;;  %2439 = vmatpush1.msra.mxu1 %v2421_v14  ;;  %v2149_v14 = vadd.f32 %v4472_v35, %v1903_v54  ;;  %v2396_v60 = vadd.f32 %v2339_v33, %v2150_v41  ;;  %v2415_v35 = vmax.f32 %v2397_v12, 0.0  ;;  %v2523_v48 = vld [vmem:[#allocation10 + $0x178] sm:$0xff]  ;;  %v2513_v54 = vld [vmem:[#allocation10 + $0x128] sm:$0xff]  ;;  %v2512_v41 = vld [vmem:[#allocation10 + $0x120] sm:$0xff] }
 0x589   :  { %2440 = vmatprep.subr.mxu1 %v5771_v22  ;;  %v2146_v33 = vadd.f32 %v5389_v34, %v1900_v36  ;;  %v2412_v59 = vmax.f32 %v2394_v39, 0.0  ;;  %v2143_v40 = vadd.f32 %v5377_v55, %v1897_v47  ;;  %v2411_v1 = vmax.f32 %v2393_v46, 0.0  ;;  %v5772_v12 = vld [vmem:[#allocation17_spill] sm:$0xff]  ;;  %v3094_v36 = vld [vmem:[#allocation7 + $0x488] sm:$0xff]  ;;  %v3095_v52 = vld [vmem:[#allocation7 + $0x490] sm:$0xff] }
 0x58a   :  { %2441 = vmatpush1.msra.mxu1 %v2420_v6  ;;  %v2395_v49 = vadd.f32 %v5372_v38, %v2149_v14  ;;  %v2414_v58 = vmax.f32 %v2396_v60, 0.0  ;;  %v2145_v38 = vadd.f32 %v5383_v32, %v1899_v26  ;;  %v1913_v13 = vadd.f32 %v5341_v11, %v5394_v42  ;;  %v2519_v6 = vld [vmem:[#allocation10 + $0x158] sm:$0xff]  ;;  %v2508_v14 = vld [vmem:[#allocation10 + $0x100] sm:$0xff]  ;;  %v3100_v39 = vld [vmem:[#allocation7 + $0x4b8] sm:$0xff] }
 0x58b   :  { %2442 = vmatprep.subr.mxu1 %v5771_v22  ;;  %v2392_v34 = vadd.f32 %v5367_v3, %v2146_v33  ;;  %v2142_v3 = vadd.f32 %v5381_v61, %v1896_v31  ;;  %v2390_v62 = vadd.f32 %v5356_v4, %v2144_v51  ;;  %v2158_v4 = vadd.f32 %v2133_v25, %v1912_v37  ;;  %v2614_v60 = vld [vmem:[#allocation7 + $0x3e8] sm:$0xff]  ;;  %v3099_v33 = vld [vmem:[#allocation7 + $0x4b0] sm:$0xff]  ;;  %v3104_v46 = vld [vmem:[#allocation7 + $0x4d8] sm:$0xff] }
 0x58c   :  { %2443 = vmatpush1.msra.mxu1 %v2419_v16  ;;  %v2413_v44 = vmax.f32 %v2395_v49, 0.0  ;;  %v2391_v32 = vadd.f32 %v5352_v21, %v2145_v38  ;;  %v2389_v21 = vadd.f32 %v5345_v19, %v2143_v40  ;;  %v2159_v20 = vadd.f32 %v4487_v29, %v1913_v13  ;;  %v2514_v16 = vld [vmem:[#allocation10 + $0x130] sm:$0xff]  ;;  %v3096_v49 = vld [vmem:[#allocation7 + $0x498] sm:$0xff]  ;;  %v3098_v26 = vld [vmem:[#allocation7 + $0x4a8] sm:$0xff] }
 0x58d   :  { %2444 = vmatprep.subr.mxu1 %v5771_v22  ;;  %v2410_v23 = vmax.f32 %v2392_v34, 0.0  ;;  %v2388_v11 = vadd.f32 %v5348_v8, %v2142_v3  ;;  %v2408_v61 = vmax.f32 %v2390_v62, 0.0  ;;  %v2404_v19 = vadd.f32 %v2379_v53, %v2158_v4  ;;  %v3102_v2 = vld [vmem:[#allocation7 + $0x4c8] sm:$0xff]  ;;  %v3103_v38 = vld [vmem:[#allocation7 + $0x4d0] sm:$0xff]  ;;  %v3108_v34 = vld [vmem:[#allocation7 + $0x4f8] sm:$0xff] }
 0x58e   :  { %2445 = vmatpush1.msra.mxu1 %v2418_v15  ;;  %v2409_v55 = vmax.f32 %v2391_v32, 0.0  ;;  %v2407_v17 = vmax.f32 %v2389_v21, 0.0  ;;  %v2405_v5 = vadd.f32 %v4518_v30, %v2159_v20  ;;  %v2510_v15 = vld [vmem:[#allocation10 + $0x110] sm:$0xff]  ;;  %v3106_v47 = vld [vmem:[#allocation7 + $0x4e8] sm:$0xff]  ;;  %v3107_v51 = vld [vmem:[#allocation7 + $0x4f0] sm:$0xff] }
 0x58f   :  { %2446 = vmatprep.subr.mxu1 %v5771_v22  ;;  %v2406_v18 = vmax.f32 %v2388_v11, 0.0  ;;  %v2422_v8 = vmax.f32 %v2404_v19, 0.0  ;;  %v3110_v29 = vld [vmem:[#allocation7 + $0x508] sm:$0xff]  ;;  %v2847_v31 = vld [vmem:[#allocation7 + $0x3f0] sm:$0xff]  ;;  %v2849_v3 = vld [vmem:[#allocation7 + $0x400] sm:$0xff] }
 0x590   :  { %2447 = vmatpush1.msra.mxu1 %v2417_v57  ;;  %v2423_v42 = vmax.f32 %v2405_v5, 0.0  ;;  %v2611_v57 = vld [vmem:[#allocation7 + $0x3d0] sm:$0xff]  ;;  %v5775_v25 = vld [vmem:[#allocation18_spill] sm:$0xff]  ;;  %v2852_v37 = vld [vmem:[#allocation7 + $0x418] sm:$0xff] }
 0x591   :  { %2448 = vmatprep.subr.mxu1 %v5771_v22  ;;  %4579 = vmatprep.mubr.msk.f32.mxu0 %vm551_vm1, %v2611_v57  ;;  %v5773_v13 = vld [vmem:[#allocation16_spill] sm:$0xff]  ;;  %v5774_v62 = vld [vmem:[#allocation19_spill] sm:$0xff]  ;;  %v2853_v21 = vld [vmem:[#allocation7 + $0x420] sm:$0xff]  ;;  %v4560_v57 = vpop.f32.mrf.mxu0 }
 0x592   :  { %2449 = vmatpush1.msra.mxu1 %v2416_v24  ;;  %4580 = vmatmul.mubr.msk.f32.gmra.mxu0 %vm551_vm1, %v2612_v28  ;;  %v3093_v24 = vld [vmem:[#allocation7 + $0x480] sm:$0xff]  ;;  %v2851_v30 = vld [vmem:[#allocation7 + $0x410] sm:$0xff]  ;;  %v2856_v11 = vld [vmem:[#allocation7 + $0x438] sm:$0xff] }
 0x593   :  { %2450 = vmatprep.subr.mxu1 %v5771_v22  ;;  %4582 = vmatprep.mubr.msk.f32.mxu0 %vm551_vm1, %v2613_v56  ;;  %v2855_v20 = vld [vmem:[#allocation7 + $0x430] sm:$0xff]  ;;  %v2858_v4 = vld [vmem:[#allocation7 + $0x448] sm:$0xff]  ;;  %v2861_v5 = vld [vmem:[#allocation7 + $0x460] sm:$0xff]  ;;  %v5551_v28 = vpop.f32.mrf.mxu0 }
 0x594   :  { %2451 = vmatpush1.msra.mxu1 %v2415_v35  ;;  %v3097_v35 = vld [vmem:[#allocation7 + $0x4a0] sm:$0xff]  ;;  %v2859_v53 = vld [vmem:[#allocation7 + $0x450] sm:$0xff] }
 0x595   :  { %2452 = vmatprep.subr.mxu1 %v5771_v22  ;;  %v2863_v19 = vld [vmem:[#allocation7 + $0x470] sm:$0xff]  ;;  %v5553_v56 = vpop.f32.mrf.mxu0 }
 0x596   :  { %2453 = vmatpush1.msra.mxu1 %v2414_v58  ;;  %4583 = vmatmul.mubr.msk.f32.gmra.mxu0 %vm551_vm1, %v2614_v60  ;;  %v3101_v58 = vld [vmem:[#allocation7 + $0x4c0] sm:$0xff] }
 0x597   :  { %2454 = vmatprep.subr.mxu1 %v5771_v22  ;;  %4620 = vmatprep.mubr.msk.f32.mxu0 %vm551_vm1, %v3093_v24  ;;  %v5555_v60 = vpop.f32.mrf.mxu0 }
 0x598   :  { %2455 = vmatpush1.msra.mxu1 %v2413_v44  ;;  %v3105_v44 = vld [vmem:[#allocation7 + $0x4e0] sm:$0xff] }
 0x599   :  { %2456 = vmatprep.subr.mxu1 %v5771_v22  ;;  %v5557_v24 = vpop.f32.mrf.mxu0 }
 0x59a   :  { %2457 = vmatpush1.msra.mxu1 %v2412_v59  ;;  %4621 = vmatmul.mubr.msk.f32.vlgmr.msra.gmra.mxu0 %vm551_vm1, %v3094_v36  ;;  %v3109_v59 = vld [vmem:[#allocation7 + $0x500] sm:$0xff] }
 0x59b   :  { %2458 = vmatprep.subr.mxu1 %v5771_v22  ;;  %4623 = vmatprep.mubr.msk.f32.mxu0 %vm551_vm1, %v3095_v52  ;;  %v5559_v36 = vpop.f32.mrf.mxu0 }
 0x59c   :  { %2459 = vmatpush1.msra.mxu1 %v2411_v1  ;;  %v2848_v1 = vld [vmem:[#allocation7 + $0x3f8] sm:$0xff] }
 0x59d   :  { %2460 = vmatprep.subr.mxu1 %v5771_v22  ;;  %v5561_v52 = vpop.f32.mrf.mxu0 }
 0x59e   :  { %2461 = vmatpush1.msra.mxu1 %v2410_v23  ;;  %4624 = vmatmul.mubr.msk.f32.gmra.mxu0 %vm551_vm1, %v3096_v49  ;;  %v2850_v23 = vld [vmem:[#allocation7 + $0x408] sm:$0xff] }
 0x59f   :  { %2462 = vmatprep.subr.mxu1 %v5771_v22  ;;  %4626 = vmatprep.mubr.msk.f32.mxu0 %vm551_vm1, %v3097_v35  ;;  %v5563_v49 = vpop.f32.mrf.mxu0 }
 0x5a0   :  { %2463 = vmatpush1.msra.mxu1 %v2409_v55  ;;  %v2854_v55 = vld [vmem:[#allocation7 + $0x428] sm:$0xff] }
 0x5a1   :  { %2464 = vmatprep.subr.mxu1 %v5771_v22  ;;  %v5565_v35 = vpop.f32.mrf.mxu0 }
 0x5a2   :  { %2465 = vmatpush1.msra.mxu1 %v2408_v61  ;;  %4627 = vmatmul.mubr.msk.f32.gmra.mxu0 %vm551_vm1, %v3098_v26  ;;  %v2857_v61 = vld [vmem:[#allocation7 + $0x440] sm:$0xff] }
 0x5a3   :  { %2466 = vmatprep.subr.mxu1 %v5771_v22  ;;  %4629 = vmatprep.mubr.msk.f32.mxu0 %vm551_vm1, %v3099_v33  ;;  %v5567_v26 = vpop.f32.mrf.mxu0 }
 0x5a4   :  { %2467 = vmatpush1.msra.mxu1 %v2407_v17  ;;  %v2860_v17 = vld [vmem:[#allocation7 + $0x458] sm:$0xff] }
 0x5a5   :  { %2468 = vmatprep.subr.mxu1 %v5771_v22  ;;  %v5569_v33 = vpop.f32.mrf.mxu0 }
 0x5a6   :  { %2469 = vmatpush1.msra.mxu1 %v2406_v18  ;;  %4630 = vmatmul.mubr.msk.f32.gmra.mxu0 %vm551_vm1, %v3100_v39  ;;  %v2862_v18 = vld [vmem:[#allocation7 + $0x468] sm:$0xff] }
 0x5a7   :  { %2498 = vmatprep.subr.mxu1 %v5771_v22  ;;  %4632 = vmatprep.mubr.msk.f32.mxu0 %vm551_vm1, %v3101_v58  ;;  %v5571_v39 = vld.sshfl [vmem:[#allocation8 + $0xc] sm:$0x33 pattern:$0x76325410]  ;;  %v5573_v58 = vpop.f32.mrf.mxu0 }
 0x5a8   :  { %2499 = vmatpush2.msra.mxu1 %v2423_v42  ;;  %v2864_v42 = vld [vmem:[#allocation7 + $0x478] sm:$0xff]  ;;  %5776 = vst [vmem:[#allocation17_spill] sm:$0xff] %v5571_v39 }
 0x5a9   :  { %2500 = vmatprep.subr.mxu1 %v5771_v22 }
 0x5aa   :  { %2501 = vmatpush2.msra.mxu1 %v2422_v8  ;;  %4633 = vmatmul.mubr.msk.f32.gmra.mxu0 %vm551_vm1, %v3102_v2  ;;  %v3339_v8 = vld [vmem:[#allocation7 + $0x510] sm:$0xff]  ;;  %v3612_v2 = vcombine.high %v5571_v39, %v5571_v39 }
 0x5ab   :  { %2503 = vmatmul.mubr.f32.vlgmr.msra.gmra.mxu1 %v5324_v50  ;;  %4519 = vmatprep.subr.mxu1 %v5771_v22  ;;  %v2518_v50 = vld [vmem:[#allocation10 + $0x150] sm:$0xff] }
 0x5ac   :  { %4520 = vmatpush3.msra.mxu1 %v2523_v48  ;;  %4551 = vmatprep.mubr.msk.f32.mxu1 %vm4867_vm2, %v5771_v22  ;;  %v3340_v48 = vld [vmem:[#allocation7 + $0x518] sm:$0xff] }
 0x5ad   :  { %4521 = vmatprep.subr.mxu1 %v5771_v22  ;;  %4635 = vmatprep.mubr.msk.f32.mxu0 %vm551_vm1, %v3103_v38  ;;  %v3701_v38 = vld [vmem:[#allocation10 + $0x1f8] sm:$0xff] }
 0x5ae   :  { %4522 = vmatpush3.msra.mxu1 %v2522_v10  ;;  %4636 = vmatmul.mubr.msk.f32.gmra.mxu0 %vm551_vm1, %v3104_v46  ;;  %v3341_v10 = vld [vmem:[#allocation7 + $0x520] sm:$0xff] }
 0x5af   :  { %4523 = vmatprep.subr.mxu1 %v5771_v22  ;;  %4638 = vmatprep.mubr.msk.f32.mxu0 %vm551_vm1, %v3105_v44  ;;  %v3700_v46 = vld [vmem:[#allocation10 + $0x1f0] sm:$0xff]  ;;  %v5578_v44 = vpop.f32.mrf.mxu0 }
 0x5b0   :  { %4524 = vmatpush3.msra.mxu1 %v2521_v7  ;;  %v3342_v7 = vld [vmem:[#allocation7 + $0x528] sm:$0xff] }
 0x5b1   :  { %4525 = vmatprep.subr.mxu1 %v5771_v22 }
 0x5b2   :  { %4526 = vmatpush3.msra.mxu1 %v2520_v45  ;;  %4639 = vmatmul.mubr.msk.f32.gmra.mxu0 %vm551_vm1, %v3106_v47  ;;  %v3343_v45 = vld [vmem:[#allocation7 + $0x530] sm:$0xff]  ;;  %v3699_v47 = vld [vmem:[#allocation10 + $0x1e8] sm:$0xff] }
 0x5b3   :  { %4527 = vmatprep.subr.mxu1 %v5771_v22  ;;  %4641 = vmatprep.mubr.msk.f32.mxu0 %vm551_vm1, %v3107_v51  ;;  %v3698_v51 = vld [vmem:[#allocation10 + $0x1e0] sm:$0xff] }
 0x5b4   :  { %4528 = vmatpush3.msra.mxu1 %v2519_v6  ;;  %v3344_v6 = vld [vmem:[#allocation7 + $0x538] sm:$0xff] }
 0x5b5   :  { %4529 = vmatprep.subr.mxu1 %v5771_v22 }
 0x5b6   :  { %4530 = vmatpush3.msra.mxu1 %v2518_v50  ;;  %4642 = vmatmul.mubr.msk.f32.gmra.mxu0 %vm551_vm1, %v3108_v34  ;;  %v3345_v50 = vld [vmem:[#allocation7 + $0x540] sm:$0xff]  ;;  %v5582_v34 = vpop.f32.mrf.mxu0 }
 0x5b7   :  { %4531 = vmatprep.subr.mxu1 %v5771_v22  ;;  %4644 = vmatprep.mubr.msk.f32.mxu0 %vm551_vm1, %v3109_v59  ;;  %v3697_v59 = vld [vmem:[#allocation10 + $0x1d8] sm:$0xff] }
 0x5b8   :  { %4532 = vmatpush3.msra.mxu1 %v2517_v9  ;;  %v3346_v9 = vld [vmem:[#allocation7 + $0x548] sm:$0xff] }
 0x5b9   :  { %4533 = vmatprep.subr.mxu1 %v5771_v22 }
 0x5ba   :  { %4534 = vmatpush3.msra.mxu1 %v2516_v27  ;;  %4645 = vmatmul.mubr.msk.f32.gmra.mxu0 %vm551_vm1, %v3110_v29  ;;  %v3347_v27 = vld [vmem:[#allocation7 + $0x550] sm:$0xff]  ;;  %v3696_v29 = vld [vmem:[#allocation10 + $0x1d0] sm:$0xff] }
 0x5bb   :  { %4535 = vmatprep.subr.mxu1 %v5771_v22  ;;  %3994 = vmatprep.mubr.msk.f32.mxu0 %vm551_vm1, %v3612_v2 }
 0x5bc   :  { %4536 = vmatpush3.msra.mxu1 %v2515_v43  ;;  %v3348_v43 = vld [vmem:[#allocation7 + $0x558] sm:$0xff] }
 0x5bd   :  { %4537 = vmatprep.subr.mxu1 %v5771_v22 }
 0x5be   :  { %4538 = vmatpush3.msra.mxu1 %v2514_v16  ;;  %v3349_v16 = vld [vmem:[#allocation7 + $0x560] sm:$0xff] }
 0x5bf   :  { %4539 = vmatprep.subr.mxu1 %v5771_v22 }
 0x5c0   :  { %4540 = vmatpush3.msra.mxu1 %v2513_v54  ;;  %v3350_v54 = vld [vmem:[#allocation7 + $0x568] sm:$0xff] }
 0x5c1   :  { %4541 = vmatprep.subr.mxu1 %v5771_v22 }
 0x5c2   :  { %4542 = vmatpush3.msra.mxu1 %v2512_v41  ;;  %v3351_v41 = vld [vmem:[#allocation7 + $0x570] sm:$0xff] }
 0x5c3   :  { %4543 = vmatprep.subr.mxu1 %v5771_v22 }
 0x5c4   :  { %4544 = vmatpush3.msra.mxu1 %v2511_v63  ;;  %v3352_v63 = vld [vmem:[#allocation7 + $0x578] sm:$0xff] }
 0x5c5   :  { %4545 = vmatprep.subr.mxu1 %v5771_v22 }
 0x5c6   :  { %4546 = vmatpush3.msra.mxu1 %v2510_v15  ;;  %v3353_v15 = vld [vmem:[#allocation7 + $0x580] sm:$0xff] }
 0x5c7   :  { %4547 = vmatprep.subr.mxu1 %v5771_v22 }
 0x5c8   :  { %4548 = vmatpush3.msra.mxu1 %v2509_v0  ;;  %v3354_v0 = vld [vmem:[#allocation7 + $0x588] sm:$0xff] }
 0x5c9   :  { %4549 = vmatprep.subr.mxu1 %v5771_v22 }
 0x5ca   :  { %4550 = vmatpush3.msra.mxu1 %v2508_v14  ;;  %v3355_v14 = vld [vmem:[#allocation7 + $0x590] sm:$0xff] }
 0x5cb   :  { %4585 = vmatprep.subr.mxu1 %v5772_v12 }
 0x66b   :  { %v2504_v40 = vpop.f32.mrf.mxu1 }
 0x66c   :  { %4552 = vmatmul.mubr.f32.vlgmr.msra.gmra.mxu1 %v2504_v40  ;;  %v3695_v40 = vld [vmem:[#allocation10 + $0x1c8] sm:$0xff] }
 0x66d   :  { %4586 = vmatpush3.msra.mxu1 %v5772_v12  ;;  %v2506_v32 = vpop.f32.mrf.mxu1  ;;  %4589 = vmatprep.mubr.msk.f32.mxu1 %vm551_vm1, %v2847_v31  ;;  %v3356_v12 = vld [vmem:[#allocation7 + $0x598] sm:$0xff]  ;;  %v5586_v31 = vpop.f32.mrf.mxu0 }
 0x66e   :  { %4587 = vmatprep.subr.mxu1 %v5773_v13  ;;  %v3694_v32 = vld [vmem:[#allocation10 + $0x1c0] sm:$0xff] }
 0x66f   :  { %4588 = vmatpush3.msra.mxu1 %v5773_v13  ;;  %v3693_v13 = vld [vmem:[#allocation10 + $0x1b8] sm:$0xff] }
 0x670   :  { %4647 = vmatprep.subr.mxu1 %v5774_v62  ;;  %4590 = vmatmul.mubr.msk.f32.vlgmr.msra.gmra.mxu1 %vm551_vm1, %v2848_v1  ;;  %v5590_v1 = vpop.f32.mrf.mxu0 }
 0x671   :  { %4648 = vmatpush3.msra.mxu1 %v5774_v62  ;;  %4592 = vmatprep.mubr.msk.f32.mxu1 %vm551_vm1, %v2849_v3  ;;  %v3692_v3 = vld [vmem:[#allocation10 + $0x1b0] sm:$0xff]  ;;  %v5597_v62 = vld [vmem:[%s5753_s2 + $0x3] ss:$0 sm:$0xff]  ;;  %s4868_s2 = smov [#allocation11]  }
 0x672   :  { %4649 = vmatprep.subr.mxu1 %v5775_v25  ;;  %v2840_v39 = vadd.f32 %v5597_v62, %v5582_v34  ;;  %s3781_s13 = sshll.u32 %s4868_s2, 4  ;;  %s3782_s13 = int_to_ptr.vmem [resolvable:$true] %s3781_s13 }
 0x673   :  { %4650 = vmatpush3.msra.mxu1 %v5775_v25  ;;  %v3691_v25 = vld [vmem:[#allocation10 + $0x1a8] sm:$0xff]  ;;  %s4827_s14 = scalar_lea.vmem %s3782_s13, 32  ;;  %p4832_p12 = scmp.lt.s32.totalorder %s3782_s13, %s3782_s13 }
 0x674   :  { %4593 = vmatmul.mubr.msk.f32.gmra.mxu1 %vm551_vm1, %v2850_v23  ;;  %4678 = vmatprep.subr.mxu1 %v5771_v22  ;;  %v5599_v23 = vpop.f32.mrf.mxu0  ;;  %p4828_p11 = scmp.ne.s32.totalorder %s3782_s13, %s4827_s14  ;;  %p4833_p13 = scmp.lt.s32.totalorder %s4827_s14, %s4827_s14 }
 0x675   :  { %4595 = vmatprep.mubr.msk.f32.mxu1 %vm551_vm1, %v2851_v30 }
 0x676   :  { %p4834_p0 = por %p4833_p13, %p4832_p12 }
 0x678   :  { %4596 = vmatmul.mubr.msk.f32.gmra.mxu1 %vm551_vm1, %v2852_v37  ;;  %v3690_v37 = vld [vmem:[#allocation10 + $0x1a0] sm:$0xff]  ;;  %p4835_p1 = pnand %p4834_p0, %p4828_p11 }
 0x679   :  { %4598 = vmatprep.mubr.msk.f32.mxu1 %vm551_vm1, %v2853_v21  ;;  %v2829_v21 = vadd.f32 %v4560_v57, %v5597_v62  ;;  %v2834_v57 = vadd.f32 %v5597_v62, %v5563_v49 }
 0x67c   :  { %4599 = vmatmul.mubr.msk.f32.gmra.mxu1 %vm551_vm1, %v2854_v55  ;;  %v5777_v55 = vld [vmem:[#allocation20_spill] sm:$0xff] }
 0x67d   :  { %4601 = vmatprep.mubr.msk.f32.mxu1 %vm551_vm1, %v2855_v20 }
 0x680   :  { %4602 = vmatmul.mubr.msk.f32.gmra.mxu1 %vm551_vm1, %v2856_v11 }
 0x681   :  { %4604 = vmatprep.mubr.msk.f32.mxu1 %vm551_vm1, %v2857_v61  ;;  %v5607_v61 = vpop.f32.mrf.mxu0 }
 0x684   :  { %4605 = vmatmul.mubr.msk.f32.gmra.mxu1 %vm551_vm1, %v2858_v4  ;;  %v3689_v4 = vld [vmem:[#allocation10 + $0x198] sm:$0xff] }
 0x685   :  { %4607 = vmatprep.mubr.msk.f32.mxu1 %vm551_vm1, %v2859_v53 }
 0x688   :  { %4608 = vmatmul.mubr.msk.f32.gmra.mxu1 %vm551_vm1, %v2860_v17  ;;  %v3688_v17 = vld [vmem:[#allocation10 + $0x190] sm:$0xff] }
 0x689   :  { %4610 = vmatprep.mubr.msk.f32.mxu1 %vm551_vm1, %v2861_v5  ;;  %v2828_v5 = vadd.f32 %v5597_v62, %v5551_v28 }
 0x68c   :  { %4611 = vmatmul.mubr.msk.f32.gmra.mxu1 %vm551_vm1, %v2862_v18  ;;  %v2831_v18 = vadd.f32 %v5553_v56, %v5597_v62 }
 0x68d   :  { %4613 = vmatprep.mubr.msk.f32.mxu1 %vm551_vm1, %v2863_v19 }
 0x690   :  { %4614 = vmatmul.mubr.msk.f32.gmra.mxu1 %vm551_vm1, %v2864_v42 }
 0x691   :  { %4651 = vmatprep.mubr.msk.f32.mxu1 %vm551_vm1, %v3339_v8  ;;  %v5617_v8 = vpop.f32.mrf.mxu0 }
 0x692   :  { %5780 = vst [vmem:[#allocation18_spill] sm:$0xff] %v5617_v8 }
 0x694   :  { %4652 = vmatmul.mubr.msk.f32.vlgmr.msra.gmra.mxu1 %vm551_vm1, %v3340_v48  ;;  %v3687_v48 = vld [vmem:[#allocation10 + $0x188] sm:$0xff] }
 0x695   :  { %4654 = vmatprep.mubr.msk.f32.mxu1 %vm551_vm1, %v3341_v10  ;;  %4679 = vmatpush3.msra.mxu1 %v3701_v38 }
 0x696   :  { %4680 = vmatprep.subr.mxu1 %v5771_v22 }
 0x697   :  { %4681 = vmatpush3.msra.mxu1 %v3700_v46 }
 0x698   :  { %4655 = vmatmul.mubr.msk.f32.gmra.mxu1 %vm551_vm1, %v3342_v7  ;;  %4682 = vmatprep.subr.mxu1 %v5771_v22 }
 0x699   :  { %4657 = vmatprep.mubr.msk.f32.mxu1 %vm551_vm1, %v3343_v45  ;;  %4683 = vmatpush3.msra.mxu1 %v3699_v47  ;;  %v2830_v45 = vadd.f32 %v5597_v62, %v5555_v60 }
 0x69a   :  { %4684 = vmatprep.subr.mxu1 %v5771_v22 }
 0x69b   :  { %4685 = vmatpush3.msra.mxu1 %v3698_v51 }
 0x69c   :  { %4658 = vmatmul.mubr.msk.f32.gmra.mxu1 %vm551_vm1, %v3344_v6  ;;  %4686 = vmatprep.subr.mxu1 %v5771_v22  ;;  %v2833_v6 = vadd.f32 %v5557_v24, %v5597_v62 }
 0x69d   :  { %4660 = vmatprep.mubr.msk.f32.mxu1 %vm551_vm1, %v3345_v50  ;;  %4687 = vmatpush3.msra.mxu1 %v3697_v59 }
 0x69e   :  { %4688 = vmatprep.subr.mxu1 %v5771_v22 }
 0x69f   :  { %4689 = vmatpush3.msra.mxu1 %v3696_v29 }
 0x6a0   :  { %4661 = vmatmul.mubr.msk.f32.gmra.mxu1 %vm551_vm1, %v3346_v9  ;;  %4690 = vmatprep.subr.mxu1 %v5771_v22 }
 0x6a1   :  { %4663 = vmatprep.mubr.msk.f32.mxu1 %vm551_vm1, %v3347_v27  ;;  %4691 = vmatpush3.msra.mxu1 %v3695_v40  ;;  %v5629_v27 = vpop.f32.mrf.mxu0 }
 0x6a2   :  { %4692 = vmatprep.subr.mxu1 %v5771_v22  ;;  %5782 = vst [vmem:[#allocation21_spill] sm:$0xff] %v5629_v27 }
 0x6a3   :  { %4693 = vmatpush3.msra.mxu1 %v3694_v32 }
 0x6a4   :  { %4664 = vmatmul.mubr.msk.f32.gmra.mxu1 %vm551_vm1, %v3348_v43  ;;  %4694 = vmatprep.subr.mxu1 %v5771_v22 }
 0x6a5   :  { %4666 = vmatprep.mubr.msk.f32.mxu1 %vm551_vm1, %v3349_v16  ;;  %4695 = vmatpush3.msra.mxu1 %v3693_v13 }
 0x6a6   :  { %4696 = vmatprep.subr.mxu1 %v5771_v22 }
 0x6a7   :  { %4697 = vmatpush3.msra.mxu1 %v3692_v3 }
 0x6a8   :  { %4667 = vmatmul.mubr.msk.f32.gmra.mxu1 %vm551_vm1, %v3350_v54  ;;  %4698 = vmatprep.subr.mxu1 %v5771_v22  ;;  %v2832_v54 = vadd.f32 %v5597_v62, %v5559_v36 }
 0x6a9   :  { %4669 = vmatprep.mubr.msk.f32.mxu1 %vm551_vm1, %v3351_v41  ;;  %4699 = vmatpush3.msra.mxu1 %v3691_v25  ;;  %v2835_v41 = vadd.f32 %v5561_v52, %v5597_v62 }
 0x6aa   :  { %4700 = vmatprep.subr.mxu1 %v5771_v22 }
 0x6ab   :  { %4701 = vmatpush3.msra.mxu1 %v3690_v37 }
 0x6ac   :  { %4670 = vmatmul.mubr.msk.f32.gmra.mxu1 %vm551_vm1, %v3352_v63  ;;  %4702 = vmatprep.subr.mxu1 %v5771_v22 }
 0x6ad   :  { %4672 = vmatprep.mubr.msk.f32.mxu1 %vm551_vm1, %v3353_v15  ;;  %4703 = vmatpush3.msra.mxu1 %v3689_v4  ;;  %v5640_v15 = vpop.f32.mrf.mxu0 }
 0x6ae   :  { %4704 = vmatprep.subr.mxu1 %v5771_v22 }
 0x6af   :  { %4705 = vmatpush3.msra.mxu1 %v3688_v17  ;;  %v5648_v56 = vpop.f32.mrf.mxu0 }
 0x6b0   :  { %4673 = vmatmul.mubr.msk.f32.gmra.mxu1 %vm551_vm1, %v3354_v0  ;;  %4706 = vmatprep.subr.mxu1 %v5771_v22 }
 0x6b1   :  { %4675 = vmatprep.mubr.msk.f32.mxu1 %vm551_vm1, %v3355_v14  ;;  %4707 = vmatpush3.msra.mxu1 %v3687_v48  ;;  %v5652_v52 = vpop.f32.mrf.mxu0 }
 0x6b2   :  { %4708 = vmatprep.subr.mxu1 %v5771_v22 }
 0x6b3   :  { %v5656_v46 = vpop.f32.mrf.mxu0 }
 0x6b4   :  { %4676 = vmatmul.mubr.msk.f32.gmra.mxu1 %vm551_vm1, %v3356_v12 }
 0x6b5   :  { %4710 = vmatprep.mubr.msk.f32.mxu1 %vm4867_vm2, %v5771_v22  ;;  %v5658_v59 = vpop.f32.mrf.mxu0 }
 0x6b7   :  { %v5660_v40 = vpop.f32.mrf.mxu0 }
 0x6b9   :  { %v4634_v3 = vpop.f32.mrf.mxu0 }
 0x6bb   :  { %v3271_v37 = vpop.f32.mrf.mxu0 }
 0x72c   :  { %v2590_v30 = vpop.f32.mrf.mxu1 }
 0x72d   :  { %v5605_v20 = vadd.f32 %v2590_v30, %v5777_v55 }
 0x72e   :  { %v4553_v11 = vpop.f32.mrf.mxu1 }
 0x72f   :  { %5778 = vst [vmem:[#allocation16_spill] sm:$0xff] %v5605_v20  ;;  %v4637_v11 = vpop.f32.mrf.mxu0  ;;  %v2839_v20 = vadd.f32 %v5569_v33, %v5597_v62 }
 0x730   :  { %v4591_v53 = vpop.f32.mrf.mxu1 }
 0x731   :  { %v5615_v19 = vadd.f32 %v4591_v53, %v2829_v21  ;;  %v3281_v17 = vpop.f32.mrf.mxu0 }
 0x732   :  { %v2985_v42 = vpop.f32.mrf.mxu1 }
 0x733   :  { %5779 = vst [vmem:[#allocation19_spill] sm:$0xff] %v5615_v19  ;;  %v5620_v10 = vadd.f32 %v2985_v42, %v2828_v5  ;;  %v4640_v42 = vpop.f32.mrf.mxu0 }
 0x734   :  { %v4594_v7 = vpop.f32.mrf.mxu1 }
 0x735   :  { %5781 = vst [vmem:[#allocation20_spill] sm:$0xff] %v5620_v10  ;;  %v5627_v50 = vadd.f32 %v4594_v7, %v2831_v18 }
 0x736   :  { %v2995_v9 = vpop.f32.mrf.mxu1 }
 0x737   :  { %v5632_v43 = vadd.f32 %v2995_v9, %v2830_v45  ;;  %v3291_v45 = vpop.f32.mrf.mxu0  ;;  %v2843_v9 = vadd.f32 %v5586_v31, %v5597_v62 }
 0x738   :  { %v4597_v16 = vpop.f32.mrf.mxu1 }
 0x739   :  { %v5638_v63 = vadd.f32 %v4597_v16, %v2833_v6 }
 0x73a   :  { %v3005_v0 = vpop.f32.mrf.mxu1 }
 0x73b   :  { %v5642_v14 = vadd.f32 %v3005_v0, %v2832_v54  ;;  %v2841_v54 = vadd.f32 %v5578_v44, %v5597_v62  ;;  %v2837_v44 = vadd.f32 %v5565_v35, %v5597_v62 }
 0x73c   :  { %v4600_v12 = vpop.f32.mrf.mxu1 }
 0x73d   :  { %v5646_v28 = vadd.f32 %v4600_v12, %v2835_v41  ;;  %v4643_v41 = vpop.f32.mrf.mxu0  ;;  %v2842_v12 = vadd.f32 %v5597_v62, %v5590_v1  ;;  %v2838_v1 = vadd.f32 %v5597_v62, %v5573_v58 }
 0x73e   :  { %v3015_v60 = vpop.f32.mrf.mxu1 }
 0x73f   :  { %v5650_v24 = vadd.f32 %v3015_v60, %v2834_v57  ;;  %v3301_v31 = vpop.f32.mrf.mxu0 }
 0x740   :  { %v4603_v36 = vpop.f32.mrf.mxu1 }
 0x742   :  { %v5654_v2 = vpop.f32.mrf.mxu1 }
 0x744   :  { %v4606_v38 = vpop.f32.mrf.mxu1 }
 0x746   :  { %v3035_v47 = vpop.f32.mrf.mxu1 }
 0x747   :  { %v3084_v8 = vadd.f32 %v3035_v47, %v2838_v1 }
 0x748   :  { %v4609_v51 = vpop.f32.mrf.mxu1 }
 0x74a   :  { %v3045_v49 = vpop.f32.mrf.mxu1 }
 0x74b   :  { %v3086_v27 = vadd.f32 %v3045_v49, %v2840_v39  ;;  %v2836_v39 = vadd.f32 %v5597_v62, %v5567_v26  ;;  %v3083_v49 = vadd.f32 %v4603_v36, %v2837_v44 }
 0x74c   :  { %v4612_v29 = vpop.f32.mrf.mxu1 }
 0x74d   :  { %v3089_v57 = vadd.f32 %v4612_v29, %v2843_v9  ;;  %v3085_v9 = vadd.f32 %v4606_v38, %v2839_v20  ;;  %v3332_v34 = vadd.f32 %v3291_v45, %v3086_v27  ;;  %v3082_v58 = vadd.f32 %v5654_v2, %v2836_v39 }
 0x74e   :  { %v3055_v32 = vpop.f32.mrf.mxu1  ;;  %v3330_v20 = vadd.f32 %v3281_v17, %v3084_v8  ;;  %v3329_v27 = vadd.f32 %v4634_v3, %v3083_v49  ;;  %v3327_v8 = vadd.f32 %v5658_v59, %v5646_v28  ;;  %v3326_v3 = vadd.f32 %v5660_v40, %v5650_v24 }
 0x74f   :  { %v3335_v10 = vadd.f32 %v4643_v41, %v3089_v57  ;;  %v3331_v41 = vadd.f32 %v4637_v11, %v3085_v9  ;;  %v3328_v26 = vadd.f32 %v3271_v37, %v3082_v58  ;;  %v3325_v37 = vadd.f32 %v5652_v52, %v5638_v63 }
 0x750   :  { %v5662_v13 = vpop.f32.mrf.mxu1  ;;  %v3324_v59 = vadd.f32 %v5656_v46, %v5642_v14  ;;  %v3323_v63 = vadd.f32 %v5640_v15, %v5627_v50  ;;  %v3322_v14 = vadd.f32 %v5648_v56, %v5632_v43  ;;  %v5788_v50 = vld [vmem:[#allocation19_spill] sm:$0xff]  ;;  %v5789_v15 = vld [vmem:[#allocation18_spill] sm:$0xff]  ;;  %v5792_v56 = vld [vmem:[#allocation20_spill] sm:$0xff] }
 0x751   :  { %5783 = vst [vmem:[#allocation22_spill] sm:$0xff] %v5662_v13 }
 0x752   :  { %v5664_v25 = vpop.f32.mrf.mxu1 }
 0x753   :  { %5784 = vst [vmem:[#allocation23_spill] sm:$0xff] %v5664_v25 }
 0x754   :  { %v5666_v30 = vpop.f32.mrf.mxu1 }
 0x755   :  { %5785 = vst [vmem:[#allocation24_spill] sm:$0xff] %v5666_v30  ;;  %v3088_v30 = vadd.f32 %v3055_v32, %v2842_v12 }
 0x756   :  { %v5668_v21 = vpop.f32.mrf.mxu1 }
 0x757   :  { %5786 = vst [vmem:[#allocation25_spill] sm:$0xff] %v5668_v21  ;;  %v3087_v21 = vadd.f32 %v4609_v51, %v2841_v54  ;;  %v3334_v13 = vadd.f32 %v3301_v31, %v3088_v30 }
 0x758   :  { %v5670_v55 = vpop.f32.mrf.mxu1 }
 0x759   :  { %v3569_v46 = vadd.f32 %v5670_v55, %v3323_v63  ;;  %v5793_v55 = vld [vmem:[#allocation21_spill] sm:$0xff] }
 0x75a   :  { %v5672_v4 = vpop.f32.mrf.mxu1 }
 0x75b   :  { %5787 = vst [vmem:[#allocation26_spill] sm:$0xff] %v5672_v4  ;;  %v3333_v4 = vadd.f32 %v4640_v42, %v3087_v21  ;;  %v5790_v42 = vld [vmem:[#allocation22_spill] sm:$0xff] }
 0x75c   :  { %v5674_v53 = vpop.f32.mrf.mxu1 }
 0x75d   :  { %v3571_v24 = vadd.f32 %v5674_v53, %v3325_v37 }
 0x75e   :  { %v5676_v5 = vpop.f32.mrf.mxu1  ;;  %v5796_v1 = vld [vmem:[#allocation25_spill] sm:$0xff] }
 0x75f   :  { %v3570_v52 = vadd.f32 %v5676_v5, %v3324_v59  ;;  %v3589_v53 = vmax.f32 %v3571_v24, 0.0  ;;  %v3321_v5 = vadd.f32 %v5789_v15, %v5788_v50 }
 0x760   :  { %v5678_v18 = vpop.f32.mrf.mxu1 }
 0x761   :  { %v3573_v30 = vadd.f32 %v5678_v18, %v3327_v8  ;;  %v2844_v18 = vadd.f32 %v5597_v62, %v5607_v61  ;;  %v5795_v61 = vld [vmem:[#allocation24_spill] sm:$0xff] }
 0x762   :  { %v5680_v48 = vpop.f32.mrf.mxu1  ;;  %v3567_v57 = vadd.f32 %v5795_v61, %v3321_v5 }
 0x763   :  { %v3572_v11 = vadd.f32 %v5680_v48, %v3326_v3  ;;  %v3591_v40 = vmax.f32 %v3573_v30, 0.0 }
 0x764   :  { %v4665_v7 = vpop.f32.mrf.mxu1 }
 0x765   :  { %v3575_v36 = vadd.f32 %v4665_v7, %v3329_v27  ;;  %v3590_v17 = vmax.f32 %v3572_v11, 0.0  ;;  %v5791_v7 = vld [vmem:[#allocation26_spill] sm:$0xff] }
 0x766   :  { %v3517_v6 = vpop.f32.mrf.mxu1  ;;  %v3568_v45 = vadd.f32 %v5791_v7, %v3322_v14 }
 0x767   :  { %v3574_v2 = vadd.f32 %v3517_v6, %v3328_v26  ;;  %v3593_v21 = vmax.f32 %v3575_v36, 0.0  ;;  %v3588_v6 = vmax.f32 %v3570_v52, 0.0 }
 0x768   :  { %v4668_v16 = vpop.f32.mrf.mxu1  ;;  %v3586_v9 = vmax.f32 %v3568_v45, 0.0 }
 0x769   :  { %v3592_v28 = vmax.f32 %v3574_v2, 0.0 }
 0x76a   :  { %v3527_v0 = vpop.f32.mrf.mxu1 }
 0x76c   :  { %v4671_v60 = vpop.f32.mrf.mxu1 }
 0x76d   :  { %v3579_v51 = vadd.f32 %v4671_v60, %v3333_v4  ;;  %v2845_v4 = vadd.f32 %v5599_v23, %v5597_v62  ;;  %v4646_v23 = vpop.f32.mrf.mxu0  ;;  %v3587_v60 = vmax.f32 %v3569_v46, 0.0 }
 0x76e   :  { %v3537_v25 = vpop.f32.mrf.mxu1 }
 0x76f   :  { %v3578_v35 = vadd.f32 %v3537_v25, %v3332_v34  ;;  %v3597_v38 = vmax.f32 %v3579_v51, 0.0  ;;  %v3091_v48 = vadd.f32 %v5790_v42, %v2845_v4  ;;  %v3311_v31 = vpop.f32.mrf.mxu0  ;;  %v3585_v34 = vmax.f32 %v3567_v57, 0.0 }
 0x770   :  { %v4674_v29 = vpop.f32.mrf.mxu1 }
 0x771   :  { %v3581_v33 = vadd.f32 %v4674_v29, %v3335_v10  ;;  %v3577_v10 = vadd.f32 %v4668_v16, %v3331_v41  ;;  %v3596_v47 = vmax.f32 %v3578_v35, 0.0  ;;  %v3320_v16 = vadd.f32 %v5793_v55, %v5792_v56  ;;  %v5797_v35 = vld [vmem:[#allocation17_spill] sm:$0xff] }
 0x772   :  { %v3547_v19 = vpop.f32.mrf.mxu1  ;;  %v3337_v44 = vadd.f32 %v4646_v23, %v3091_v48 }
 0x773   :  { %v3599_v32 = vmax.f32 %v3581_v33, 0.0  ;;  %v3580_v54 = vadd.f32 %v3547_v19, %v3334_v13  ;;  %v3576_v19 = vadd.f32 %v3527_v0, %v3330_v20  ;;  %v3595_v13 = vmax.f32 %v3577_v10, 0.0  ;;  %v5794_v0 = vld [vmem:[#allocation23_spill] sm:$0xff] }
 0x774   :  { %v4677_v43 = vpop.f32.mrf.mxu1  ;;  %v3090_v62 = vadd.f32 %v5794_v0, %v2844_v18  ;;  %v3566_v29 = vadd.f32 %v5796_v1, %v3320_v16 }
 0x775   :  { %v3598_v12 = vmax.f32 %v3580_v54, 0.0  ;;  %3617 = vmatpush1.msra.mxu0 %v3599_v32  ;;  %v3594_v25 = vmax.f32 %v3576_v19, 0.0  ;;  %v3583_v32 = vadd.f32 %v4677_v43, %v3337_v44 }
 0x776   :  { %3618 = vmatprep.subr.mxu0 %v5771_v22  ;;  %v3557_v33 = vpop.f32.mrf.mxu1  ;;  %v3336_v51 = vadd.f32 %v3311_v31, %v3090_v62  ;;  %v3584_v54 = vmax.f32 %v3566_v29, 0.0 }
 0x777   :  { %3619 = vmatpush1.msra.mxu0 %v3598_v12  ;;  %v3601_v49 = vmax.f32 %v3583_v32, 0.0  ;;  %v3686_v12 = vld [vmem:[#allocation10 + $0x180] sm:$0xff] }
 0x778   :  { %3620 = vmatprep.subr.mxu0 %v5771_v22  ;;  %v3582_v39 = vadd.f32 %v3557_v33, %v3336_v51  ;;  %4709 = vmatpush3.msra.mxu1 %v3686_v12 }
 0x779   :  { %3621 = vmatpush1.msra.mxu0 %v3597_v38  ;;  %v5798_v38 = vld [vmem:[#allocation16_spill] sm:$0xff] }
 0x77a   :  { %3622 = vmatprep.subr.mxu0 %v5771_v22  ;;  %v3600_v41 = vmax.f32 %v3582_v39, 0.0 }
 0x77b   :  { %3623 = vmatpush1.msra.mxu0 %v3596_v47 }
 0x77c   :  { %3624 = vmatprep.subr.mxu0 %v5771_v22 }
 0x77d   :  { %3625 = vmatpush1.msra.mxu0 %v3595_v13 }
 0x77e   :  { %3626 = vmatprep.subr.mxu0 %v5771_v22 }
 0x77f   :  { %3627 = vmatpush1.msra.mxu0 %v3594_v25 }
 0x780   :  { %3628 = vmatprep.subr.mxu0 %v5771_v22 }
 0x781   :  { %3629 = vmatpush1.msra.mxu0 %v3593_v21 }
 0x782   :  { %3630 = vmatprep.subr.mxu0 %v5771_v22 }
 0x783   :  { %3631 = vmatpush1.msra.mxu0 %v3592_v28 }
 0x784   :  { %3632 = vmatprep.subr.mxu0 %v5771_v22 }
 0x785   :  { %3633 = vmatpush1.msra.mxu0 %v3591_v40 }
 0x786   :  { %3634 = vmatprep.subr.mxu0 %v5771_v22 }
 0x787   :  { %3635 = vmatpush1.msra.mxu0 %v3590_v17 }
 0x788   :  { %3636 = vmatprep.subr.mxu0 %v5771_v22 }
 0x789   :  { %3637 = vmatpush1.msra.mxu0 %v3589_v53 }
 0x78a   :  { %3638 = vmatprep.subr.mxu0 %v5771_v22 }
 0x78b   :  { %3639 = vmatpush1.msra.mxu0 %v3588_v6 }
 0x78c   :  { %3640 = vmatprep.subr.mxu0 %v5771_v22 }
 0x78d   :  { %3641 = vmatpush1.msra.mxu0 %v3587_v60 }
 0x78e   :  { %3642 = vmatprep.subr.mxu0 %v5771_v22 }
 0x78f   :  { %3643 = vmatpush1.msra.mxu0 %v3586_v9 }
 0x790   :  { %3644 = vmatprep.subr.mxu0 %v5771_v22 }
 0x791   :  { %3645 = vmatpush1.msra.mxu0 %v3585_v34 }
 0x792   :  { %3646 = vmatprep.subr.mxu0 %v5771_v22 }
 0x793   :  { %3647 = vmatpush1.msra.mxu0 %v3584_v54 }
 0x794   :  { %3676 = vmatprep.subr.mxu0 %v5771_v22 }
 0x795   :  { %3677 = vmatpush2.msra.mxu0 %v3601_v49 }
 0x796   :  { %3678 = vmatprep.subr.mxu0 %v5771_v22 }
 0x797   :  { %3679 = vmatpush2.msra.mxu0 %v3600_v41 }
 0x798   :  { %3681 = vmatmul.mubr.f32.vlgmr.msra.gmra.mxu0 %v5797_v35 }
 0x858   :  { %v3682_v58 = vpop.f32.mrf.mxu0 }
 0x859   :  { %4711 = vmatmul.mubr.f32.vlgmr.msra.gmra.mxu1 %v3682_v58 }
 0x85a   :  { %v3684_v20 = vpop.f32.mrf.mxu0 }
 0x919   :  { %v3768_v10 = vpop.f32.mrf.mxu1 }
 0x91a   :  { %v3772_v27 = vadd.f32 %v3768_v10, %v5798_v38 }
 0x91b   :  { %v4712_v19 = vpop.f32.mrf.mxu1 }
 0x91c   :  { %3774 = vst.msk [vmem:[#allocation11] sm:$0x3] %vm3773_vm3, %v3772_v27 }
 0x91d   :  { %4838 = shalt.err (!%p4835_p1)
}
 0x91e   :  { %3784 = dma.vmem_to_hbm [thread:$0]  %s3782_s13, 32, %s5758_s7, [#allocation4]  }
 0x91f   :  { %4853 = dma.done.wait [#allocation4], 32  }
 0x920   :  { %4854 = vsyncadd [#allocation4], 4294967264 }
 0x921   :  { %3788 = vsyncpa [#allocation3], 1 }
 0x922   :  { %3789 = vsyncpa [#allocation6], 1 }
 0x923   :  { %3790 = vsyncpa [#allocation9], 1 }
 0x924   :  { %3791 = vsyncpa [#allocation4], 1 }

</bundles_post_ra>
